<compile_context>
chip_gen: v7x
topology: tpu7x:2x2x1
jax: 0.10.0
libtpu: 0.0.40
codegen_flags: <defaults>
</compile_context>

<pallas_src>
import functools

import jax
import jax.numpy as jnp
from jax.experimental import pallas as pl
from jax.experimental.pallas import tpu as pltpu  # noqa: F401  (TPU backend)

F2 = 97  # x2 feature size (nn.Linear(97, 256))


# ------------------------------ fused kernel ------------------------------
# PyTorch GRU (gate order r, z, n):
#   r = sigmoid(x W_ir^T + b_ir + h W_hr^T + b_hr)
#   z = sigmoid(x W_iz^T + b_iz + h W_hz^T + b_hz)
#   n = tanh   (x W_in^T + b_in + r * (h W_hn^T + b_hn))
#   h' = (1 - z) * n + z * h
# Head: concat([h_t, mlp2(x2)]) @ Wm1 + bm1 -> ReLU -> Wm2 -> LogSoftmax, which
# is computed as the split matmul h_t @ Wm1_g + (mlp2(x2) @ Wm1_m + bm1).
def _fused_kernel(T, B,
                  x_ref, x2_ref,
                  wir_ref, wiz_ref, win_ref, br_ref, bz_ref, bin_ref,
                  whr_ref, whz_ref, whn_ref, bhn_ref,
                  w1_ref, b1_ref, w2_ref, b2_ref,
                  wm1g_ref, wm1m_ref, bm1_ref, wm2p_ref, bm2p_ref,
                  out_ref):
    f32 = jnp.float32
    bf16 = jnp.bfloat16
    H = whr_ref.shape[0]

    # ---------- time-invariant work, hoisted out of the recurrence ----------
    x = x_ref[...].astype(bf16)                                   # (T*B, I)
    gi_r = jnp.dot(x, wir_ref[...], preferred_element_type=f32) + br_ref[...]
    gi_z = jnp.dot(x, wiz_ref[...], preferred_element_type=f32) + bz_ref[...]
    gi_n = jnp.dot(x, win_ref[...], preferred_element_type=f32) + bin_ref[...]

    # mlp2(x2) and its fold into the head's first Linear, computed once.
    x2 = x2_ref[...].astype(bf16)                                 # (B, 97)
    h1 = jnp.maximum(
        jnp.dot(x2, w1_ref[...], preferred_element_type=f32) + b1_ref[...], 0.0)
    m2 = (jnp.dot(h1.astype(bf16), w2_ref[...], preferred_element_type=f32)
          + b2_ref[...])                                          # (B, 128)
    m2_bias = (jnp.dot(m2.astype(bf16), wm1m_ref[...],
                       preferred_element_type=f32) + bm1_ref[...])  # (B, MH)

    # ---------- GRU recurrence (T static & small -> fully unrolled) ----------
    h = jnp.zeros((B, H), f32)
    hs = []
    for t in range(T):                     # static unroll; values-only carry
        lo, hi = t * B, (t + 1) * B
        hb = h.astype(bf16)
        gh_r = jnp.dot(hb, whr_ref[...], preferred_element_type=f32)
        gh_z = jnp.dot(hb, whz_ref[...], preferred_element_type=f32)
        gh_n = jnp.dot(hb, whn_ref[...], preferred_element_type=f32) + bhn_ref[...]
        r = jax.nn.sigmoid(gi_r[lo:hi] + gh_r)
        z = jax.nn.sigmoid(gi_z[lo:hi] + gh_z)
        n = jnp.tanh(gi_n[lo:hi] + r * gh_n)
        h = (1.0 - z) * n + z * h
        hs.append(h)
    g_all = jnp.concatenate(hs, axis=0)                           # (T*B, H) f32

    # ---------- head: Linear -> ReLU -> Linear -> LogSoftmax (batched) -------
    m2_rep = jnp.concatenate([m2_bias] * T, axis=0)               # (T*B, MH)
    pre = (jnp.dot(g_all.astype(bf16), wm1g_ref[...],
                   preferred_element_type=f32) + m2_rep)
    hm = jnp.maximum(pre, 0.0)
    logits = (jnp.dot(hm.astype(bf16), wm2p_ref[...],
                      preferred_element_type=f32) + bm2p_ref[...])  # (T*B, 128)

    # LogSoftmax over the (lane-padded) class dim; pad lanes carry a -1e30
    # bias so they contribute ~0 to the sum and never win the max.
    m = jnp.max(logits, axis=-1, keepdims=True)
    lse = m + jnp.log(jnp.sum(jnp.exp(logits - m), axis=-1, keepdims=True))
    out_ref[...] = logits - lse                                   # lane-dense store


# ------------------------------ wrapper ------------------------------
def fv_behavior_forward(params, x, x2):
    """x: (B, T, input_size) float32, x2: (B, 1, 97) float32 -> (B, T, output)."""
    B, T, I = x.shape
    H = params["w_hh_t"].shape[0]
    MH = params["wm1_t"].shape[1]
    O = params["wm2_t"].shape[1]
    opad = ((O + 127) // 128) * 128          # lane-dense output width

    f32, bf16 = jnp.float32, jnp.bfloat16

    # Gate-split GRU weights (bf16 for the MXU), pre-summed r/z biases (fp32).
    wih = params["w_ih_t"].astype(bf16)      # (I, 3H) gate order [r, z, n]
    whh = params["w_hh_t"].astype(bf16)      # (H, 3H)
    wir, wiz, win = wih[:, :H], wih[:, H:2 * H], wih[:, 2 * H:]
    whr, whz, whn = whh[:, :H], whh[:, H:2 * H], whh[:, 2 * H:]
    b_ih = params["b_ih"].astype(f32)
    b_hh = params["b_hh"].astype(f32)
    br = b_ih[:, :H] + b_hh[:, :H]
    bz = b_ih[:, H:2 * H] + b_hh[:, H:2 * H]
    bin_ = b_ih[:, 2 * H:]                   # input-side n bias
    bhn = b_hh[:, 2 * H:]                    # hidden-side n bias (inside r*(.))

    # mlp2 weights.
    w1 = params["w1_t"].astype(bf16); b1 = params["b1"].astype(f32)
    w2 = params["w2_t"].astype(bf16); b2 = params["b2"].astype(f32)

    # Head first Linear split along the concat axis: [gru | mlp2].
    wm1g = params["wm1_t"][:H].astype(bf16)          # (H, MH)
    wm1m = params["wm1_t"][H:].astype(bf16)          # (128, MH)
    bm1 = params["bm1"].astype(f32)

    # Lane-pad the output projection to a multiple of 128; pad bias with -1e30
    # so the in-kernel log-softmax over the padded lanes is unchanged.
    wm2p = jnp.zeros((MH, opad), bf16).at[:, :O].set(params["wm2_t"].astype(bf16))
    bm2p = jnp.full((1, opad), -1e30, f32).at[:, :O].set(params["bm2"].astype(f32))

    # Time-major, flattened rows (row = t*B + b) so in-kernel matmuls are batched.
    x_flat = jnp.transpose(x, (1, 0, 2)).reshape(T * B, I).astype(f32)
    x2_2d = x2.reshape(B, F2).astype(f32)

    out_padded = pl.pallas_call(
        functools.partial(_fused_kernel, T, B),
        out_shape=jax.ShapeDtypeStruct((T * B, opad), jnp.float32),
        # grid=() : single invocation, every operand resident whole in VMEM
        # (total footprint ≪ 1 MiB), no per-timestep pipeline overhead.
    )(x_flat, x2_2d,
      wir, wiz, win, br, bz, bin_,
      whr, whz, whn, bhn,
      w1, b1, w2, b2,
      wm1g, wm1m, bm1, wm2p, bm2p)

    out = out_padded.reshape(T, B, opad)[:, :, :O]    # drop lane padding
    return jnp.transpose(out, (1, 0, 2))              # (B, T, O)


# ------------------------------ parameters ------------------------------
def init_params(key, input_size, gru_hidden, mlp_hidden, output_size):
    ks = jax.random.split(key, 12)

    def u(k, shape, fan_in):
        s = 1.0 / float(fan_in) ** 0.5
        return jax.random.uniform(k, shape, jnp.float32, -s, s)

    H = gru_hidden
    return dict(
        # GRU (PyTorch layout transposed: (in, 3H), gate order [r, z, n])
        w_ih_t=u(ks[0], (input_size, 3 * H), H),
        w_hh_t=u(ks[1], (H, 3 * H), H),
        b_ih=u(ks[2], (1, 3 * H), H),
        b_hh=u(ks[3], (1, 3 * H), H),
        # mlp2: Linear(97, 256) -> ReLU -> Linear(256, 128)
        w1_t=u(ks[4], (97, 256), 97),
        b1=u(ks[5], (1, 256), 97),
        w2_t=u(ks[6], (256, 128), 256),
        b2=u(ks[7], (1, 128), 256),
        # mlp: Linear(H + 128, mlp_hidden) -> ReLU -> Linear(mlp_hidden, out)
        wm1_t=u(ks[8], (H + 128, mlp_hidden), H + 128),
        bm1=u(ks[9], (1, mlp_hidden), H + 128),
        wm2_t=u(ks[10], (mlp_hidden, output_size), mlp_hidden),
        bm2=u(ks[11], (1, output_size), mlp_hidden),
    )


if __name__ == "__main__":
    B, T = 2, 8
    input_size, gru_hidden, mlp_hidden, output_size = 16, 32, 64, 8

    key = jax.random.PRNGKey(0)
    kp, kx, kx2 = jax.random.split(key, 3)
    params = init_params(kp, input_size, gru_hidden, mlp_hidden, output_size)

    x = jax.random.normal(kx, (B, T, input_size), jnp.float32)
    x2 = jax.random.normal(kx2, (B, 1, 97), jnp.float32)

    out = jax.jit(fv_behavior_forward)(params, x, x2)
    jax.block_until_ready(out)

    assert out.shape == (B, T, output_size)
    # Log-softmax sanity: class probabilities must sum to 1.
    probs = jnp.exp(out).sum(axis=-1)
    assert bool(jnp.allclose(probs, 1.0, atol=1e-3)), "log-softmax check failed"
    print("KERNEL_OK")
</pallas_src>

<mosaic_0001>
module attributes {stable_mosaic.version = 11 : i64} {
  func.func @_fused_kernel(%arg0: memref<16x16xf32, #tpu.memory_space<vmem>>, %arg1: memref<2x97xf32, #tpu.memory_space<vmem>>, %arg2: memref<16x32xbf16, #tpu.memory_space<vmem>>, %arg3: memref<16x32xbf16, #tpu.memory_space<vmem>>, %arg4: memref<16x32xbf16, #tpu.memory_space<vmem>>, %arg5: memref<1x32xf32, #tpu.memory_space<vmem>>, %arg6: memref<1x32xf32, #tpu.memory_space<vmem>>, %arg7: memref<1x32xf32, #tpu.memory_space<vmem>>, %arg8: memref<32x32xbf16, #tpu.memory_space<vmem>>, %arg9: memref<32x32xbf16, #tpu.memory_space<vmem>>, %arg10: memref<32x32xbf16, #tpu.memory_space<vmem>>, %arg11: memref<1x32xf32, #tpu.memory_space<vmem>>, %arg12: memref<97x256xbf16, #tpu.memory_space<vmem>>, %arg13: memref<1x256xf32, #tpu.memory_space<vmem>>, %arg14: memref<256x128xbf16, #tpu.memory_space<vmem>>, %arg15: memref<1x128xf32, #tpu.memory_space<vmem>>, %arg16: memref<32x64xbf16, #tpu.memory_space<vmem>>, %arg17: memref<128x64xbf16, #tpu.memory_space<vmem>>, %arg18: memref<1x64xf32, #tpu.memory_space<vmem>>, %arg19: memref<64x128xbf16, #tpu.memory_space<vmem>>, %arg20: memref<1x128xf32, #tpu.memory_space<vmem>>, %arg21: memref<16x128xf32, #tpu.memory_space<vmem>>) attributes {dimension_semantics = [], scalar_prefetch = 0 : i64, scratch_operands = 0 : i64, tpu.core_type = #tpu.core_type<tc>} {
    %c0 = arith.constant 0 : index
    %c0_0 = arith.constant 0 : index
    %0 = vector.load %arg0[%c0, %c0_0] : memref<16x16xf32, #tpu.memory_space<vmem>>, vector<16x16xf32>
    %1 = arith.truncf %0 : vector<16x16xf32> to vector<16x16xbf16>
    %c0_1 = arith.constant 0 : index
    %c0_2 = arith.constant 0 : index
    %2 = vector.load %arg2[%c0_1, %c0_2] : memref<16x32xbf16, #tpu.memory_space<vmem>>, vector<16x32xbf16>
    %cst = arith.constant dense<0.000000e+00> : vector<16x32xf32>
    %3 = tpu.matmul %1, %2, %cst {dimension_numbers = #tpu.dot_dimension_numbers<[1], [0], [0], [1], [0, 0, 1, 1], [], []>} : vector<16x16xbf16>, vector<16x32xbf16>, vector<16x32xf32> -> vector<16x32xf32>
    %c0_3 = arith.constant 0 : index
    %c0_4 = arith.constant 0 : index
    %4 = vector.load %arg5[%c0_3, %c0_4] : memref<1x32xf32, #tpu.memory_space<vmem>>, vector<1x32xf32>
    %5 = vector.broadcast %4 : vector<1x32xf32> to vector<16x32xf32>
    %6 = arith.addf %3, %5 : vector<16x32xf32>
    %c0_5 = arith.constant 0 : index
    %c0_6 = arith.constant 0 : index
    %7 = vector.load %arg3[%c0_5, %c0_6] : memref<16x32xbf16, #tpu.memory_space<vmem>>, vector<16x32xbf16>
    %cst_7 = arith.constant dense<0.000000e+00> : vector<16x32xf32>
    %8 = tpu.matmul %1, %7, %cst_7 {dimension_numbers = #tpu.dot_dimension_numbers<[1], [0], [0], [1], [0, 0, 1, 1], [], []>} : vector<16x16xbf16>, vector<16x32xbf16>, vector<16x32xf32> -> vector<16x32xf32>
    %c0_8 = arith.constant 0 : index
    %c0_9 = arith.constant 0 : index
    %9 = vector.load %arg6[%c0_8, %c0_9] : memref<1x32xf32, #tpu.memory_space<vmem>>, vector<1x32xf32>
    %10 = vector.broadcast %9 : vector<1x32xf32> to vector<16x32xf32>
    %11 = arith.addf %8, %10 : vector<16x32xf32>
    %c0_10 = arith.constant 0 : index
    %c0_11 = arith.constant 0 : index
    %12 = vector.load %arg4[%c0_10, %c0_11] : memref<16x32xbf16, #tpu.memory_space<vmem>>, vector<16x32xbf16>
    %cst_12 = arith.constant dense<0.000000e+00> : vector<16x32xf32>
    %13 = tpu.matmul %1, %12, %cst_12 {dimension_numbers = #tpu.dot_dimension_numbers<[1], [0], [0], [1], [0, 0, 1, 1], [], []>} : vector<16x16xbf16>, vector<16x32xbf16>, vector<16x32xf32> -> vector<16x32xf32>
    %c0_13 = arith.constant 0 : index
    %c0_14 = arith.constant 0 : index
    %14 = vector.load %arg7[%c0_13, %c0_14] : memref<1x32xf32, #tpu.memory_space<vmem>>, vector<1x32xf32>
    %15 = vector.broadcast %14 : vector<1x32xf32> to vector<16x32xf32>
    %16 = arith.addf %13, %15 : vector<16x32xf32>
    %c0_15 = arith.constant 0 : index
    %c0_16 = arith.constant 0 : index
    %17 = vector.load %arg1[%c0_15, %c0_16] : memref<2x97xf32, #tpu.memory_space<vmem>>, vector<2x97xf32>
    %18 = arith.truncf %17 : vector<2x97xf32> to vector<2x97xbf16>
    %c0_17 = arith.constant 0 : index
    %c0_18 = arith.constant 0 : index
    %19 = vector.load %arg12[%c0_17, %c0_18] : memref<97x256xbf16, #tpu.memory_space<vmem>>, vector<97x256xbf16>
    %cst_19 = arith.constant dense<0.000000e+00> : vector<2x256xf32>
    %20 = tpu.matmul %18, %19, %cst_19 {dimension_numbers = #tpu.dot_dimension_numbers<[1], [0], [0], [1], [0, 0, 1, 1], [], []>} : vector<2x97xbf16>, vector<97x256xbf16>, vector<2x256xf32> -> vector<2x256xf32>
    %c0_20 = arith.constant 0 : index
    %c0_21 = arith.constant 0 : index
    %21 = vector.load %arg13[%c0_20, %c0_21] : memref<1x256xf32, #tpu.memory_space<vmem>>, vector<1x256xf32>
    %22 = vector.broadcast %21 : vector<1x256xf32> to vector<2x256xf32>
    %23 = arith.addf %20, %22 : vector<2x256xf32>
    %cst_22 = arith.constant 0.000000e+00 : f32
    %24 = vector.broadcast %cst_22 : f32 to vector<2x256xf32>
    %25 = arith.maximumf %23, %24 : vector<2x256xf32>
    %26 = arith.truncf %25 : vector<2x256xf32> to vector<2x256xbf16>
    %c0_23 = arith.constant 0 : index
    %c0_24 = arith.constant 0 : index
    %27 = vector.load %arg14[%c0_23, %c0_24] : memref<256x128xbf16, #tpu.memory_space<vmem>>, vector<256x128xbf16>
    %cst_25 = arith.constant dense<0.000000e+00> : vector<2x128xf32>
    %28 = tpu.matmul %26, %27, %cst_25 {dimension_numbers = #tpu.dot_dimension_numbers<[1], [0], [0], [1], [0, 0, 1, 1], [], []>} : vector<2x256xbf16>, vector<256x128xbf16>, vector<2x128xf32> -> vector<2x128xf32>
    %c0_26 = arith.constant 0 : index
    %c0_27 = arith.constant 0 : index
    %29 = vector.load %arg15[%c0_26, %c0_27] : memref<1x128xf32, #tpu.memory_space<vmem>>, vector<1x128xf32>
    %30 = vector.broadcast %29 : vector<1x128xf32> to vector<2x128xf32>
    %31 = arith.addf %28, %30 : vector<2x128xf32>
    %32 = arith.truncf %31 : vector<2x128xf32> to vector<2x128xbf16>
    %c0_28 = arith.constant 0 : index
    %c0_29 = arith.constant 0 : index
    %33 = vector.load %arg17[%c0_28, %c0_29] : memref<128x64xbf16, #tpu.memory_space<vmem>>, vector<128x64xbf16>
    %cst_30 = arith.constant dense<0.000000e+00> : vector<2x64xf32>
    %34 = tpu.matmul %32, %33, %cst_30 {dimension_numbers = #tpu.dot_dimension_numbers<[1], [0], [0], [1], [0, 0, 1, 1], [], []>} : vector<2x128xbf16>, vector<128x64xbf16>, vector<2x64xf32> -> vector<2x64xf32>
    %c0_31 = arith.constant 0 : index
    %c0_32 = arith.constant 0 : index
    %35 = vector.load %arg18[%c0_31, %c0_32] : memref<1x64xf32, #tpu.memory_space<vmem>>, vector<1x64xf32>
    %36 = vector.broadcast %35 : vector<1x64xf32> to vector<2x64xf32>
    %37 = arith.addf %34, %36 : vector<2x64xf32>
    %cst_33 = arith.constant 0.000000e+00 : f32
    %38 = vector.broadcast %cst_33 : f32 to vector<2x32xf32>
    %39 = arith.truncf %38 : vector<2x32xf32> to vector<2x32xbf16>
    %c0_34 = arith.constant 0 : index
    %c0_35 = arith.constant 0 : index
    %40 = vector.load %arg8[%c0_34, %c0_35] : memref<32x32xbf16, #tpu.memory_space<vmem>>, vector<32x32xbf16>
    %cst_36 = arith.constant dense<0.000000e+00> : vector<2x32xf32>
    %41 = tpu.matmul %39, %40, %cst_36 {dimension_numbers = #tpu.dot_dimension_numbers<[1], [0], [0], [1], [0, 0, 1, 1], [], []>} : vector<2x32xbf16>, vector<32x32xbf16>, vector<2x32xf32> -> vector<2x32xf32>
    %c0_37 = arith.constant 0 : index
    %c0_38 = arith.constant 0 : index
    %42 = vector.load %arg9[%c0_37, %c0_38] : memref<32x32xbf16, #tpu.memory_space<vmem>>, vector<32x32xbf16>
    %cst_39 = arith.constant dense<0.000000e+00> : vector<2x32xf32>
    %43 = tpu.matmul %39, %42, %cst_39 {dimension_numbers = #tpu.dot_dimension_numbers<[1], [0], [0], [1], [0, 0, 1, 1], [], []>} : vector<2x32xbf16>, vector<32x32xbf16>, vector<2x32xf32> -> vector<2x32xf32>
    %c0_40 = arith.constant 0 : index
    %c0_41 = arith.constant 0 : index
    %44 = vector.load %arg10[%c0_40, %c0_41] : memref<32x32xbf16, #tpu.memory_space<vmem>>, vector<32x32xbf16>
    %cst_42 = arith.constant dense<0.000000e+00> : vector<2x32xf32>
    %45 = tpu.matmul %39, %44, %cst_42 {dimension_numbers = #tpu.dot_dimension_numbers<[1], [0], [0], [1], [0, 0, 1, 1], [], []>} : vector<2x32xbf16>, vector<32x32xbf16>, vector<2x32xf32> -> vector<2x32xf32>
    %c0_43 = arith.constant 0 : index
    %c0_44 = arith.constant 0 : index
    %46 = vector.load %arg11[%c0_43, %c0_44] : memref<1x32xf32, #tpu.memory_space<vmem>>, vector<1x32xf32>
    %47 = vector.broadcast %46 : vector<1x32xf32> to vector<2x32xf32>
    %48 = arith.addf %45, %47 : vector<2x32xf32>
    %49 = vector.extract_strided_slice %6 {offsets = [0, 0], sizes = [2, 32], strides = [1, 1]} : vector<16x32xf32> to vector<2x32xf32>
    %50 = arith.addf %49, %41 : vector<2x32xf32>
    %51 = arith.negf %50 : vector<2x32xf32>
    %52 = math.exp %51 : vector<2x32xf32>
    %cst_45 = arith.constant 1.000000e+00 : f32
    %53 = vector.broadcast %cst_45 : f32 to vector<2x32xf32>
    %54 = arith.addf %53, %52 : vector<2x32xf32>
    %55 = arith.divf %53, %54 : vector<2x32xf32>
    %56 = vector.extract_strided_slice %11 {offsets = [0, 0], sizes = [2, 32], strides = [1, 1]} : vector<16x32xf32> to vector<2x32xf32>
    %57 = arith.addf %56, %43 : vector<2x32xf32>
    %58 = arith.negf %57 : vector<2x32xf32>
    %59 = math.exp %58 : vector<2x32xf32>
    %cst_46 = arith.constant 1.000000e+00 : f32
    %60 = vector.broadcast %cst_46 : f32 to vector<2x32xf32>
    %61 = arith.addf %60, %59 : vector<2x32xf32>
    %62 = arith.divf %60, %61 : vector<2x32xf32>
    %63 = vector.extract_strided_slice %16 {offsets = [0, 0], sizes = [2, 32], strides = [1, 1]} : vector<16x32xf32> to vector<2x32xf32>
    %64 = arith.mulf %55, %48 : vector<2x32xf32>
    %65 = arith.addf %63, %64 : vector<2x32xf32>
    %66 = math.tanh %65 : vector<2x32xf32>
    %cst_47 = arith.constant 1.000000e+00 : f32
    %67 = vector.broadcast %cst_47 : f32 to vector<2x32xf32>
    %68 = arith.subf %67, %62 : vector<2x32xf32>
    %69 = arith.mulf %68, %66 : vector<2x32xf32>
    %70 = arith.mulf %62, %38 : vector<2x32xf32>
    %71 = arith.addf %69, %70 : vector<2x32xf32>
    %72 = arith.truncf %71 : vector<2x32xf32> to vector<2x32xbf16>
    %c0_48 = arith.constant 0 : index
    %c0_49 = arith.constant 0 : index
    %73 = vector.load %arg8[%c0_48, %c0_49] : memref<32x32xbf16, #tpu.memory_space<vmem>>, vector<32x32xbf16>
    %cst_50 = arith.constant dense<0.000000e+00> : vector<2x32xf32>
    %74 = tpu.matmul %72, %73, %cst_50 {dimension_numbers = #tpu.dot_dimension_numbers<[1], [0], [0], [1], [0, 0, 1, 1], [], []>} : vector<2x32xbf16>, vector<32x32xbf16>, vector<2x32xf32> -> vector<2x32xf32>
    %c0_51 = arith.constant 0 : index
    %c0_52 = arith.constant 0 : index
    %75 = vector.load %arg9[%c0_51, %c0_52] : memref<32x32xbf16, #tpu.memory_space<vmem>>, vector<32x32xbf16>
    %cst_53 = arith.constant dense<0.000000e+00> : vector<2x32xf32>
    %76 = tpu.matmul %72, %75, %cst_53 {dimension_numbers = #tpu.dot_dimension_numbers<[1], [0], [0], [1], [0, 0, 1, 1], [], []>} : vector<2x32xbf16>, vector<32x32xbf16>, vector<2x32xf32> -> vector<2x32xf32>
    %c0_54 = arith.constant 0 : index
    %c0_55 = arith.constant 0 : index
    %77 = vector.load %arg10[%c0_54, %c0_55] : memref<32x32xbf16, #tpu.memory_space<vmem>>, vector<32x32xbf16>
    %cst_56 = arith.constant dense<0.000000e+00> : vector<2x32xf32>
    %78 = tpu.matmul %72, %77, %cst_56 {dimension_numbers = #tpu.dot_dimension_numbers<[1], [0], [0], [1], [0, 0, 1, 1], [], []>} : vector<2x32xbf16>, vector<32x32xbf16>, vector<2x32xf32> -> vector<2x32xf32>
    %c0_57 = arith.constant 0 : index
    %c0_58 = arith.constant 0 : index
    %79 = vector.load %arg11[%c0_57, %c0_58] : memref<1x32xf32, #tpu.memory_space<vmem>>, vector<1x32xf32>
    %80 = vector.broadcast %79 : vector<1x32xf32> to vector<2x32xf32>
    %81 = arith.addf %78, %80 : vector<2x32xf32>
    %82 = vector.extract_strided_slice %6 {offsets = [2, 0], sizes = [2, 32], strides = [1, 1]} : vector<16x32xf32> to vector<2x32xf32>
    %83 = arith.addf %82, %74 : vector<2x32xf32>
    %84 = arith.negf %83 : vector<2x32xf32>
    %85 = math.exp %84 : vector<2x32xf32>
    %cst_59 = arith.constant 1.000000e+00 : f32
    %86 = vector.broadcast %cst_59 : f32 to vector<2x32xf32>
    %87 = arith.addf %86, %85 : vector<2x32xf32>
    %88 = arith.divf %86, %87 : vector<2x32xf32>
    %89 = vector.extract_strided_slice %11 {offsets = [2, 0], sizes = [2, 32], strides = [1, 1]} : vector<16x32xf32> to vector<2x32xf32>
    %90 = arith.addf %89, %76 : vector<2x32xf32>
    %91 = arith.negf %90 : vector<2x32xf32>
    %92 = math.exp %91 : vector<2x32xf32>
    %cst_60 = arith.constant 1.000000e+00 : f32
    %93 = vector.broadcast %cst_60 : f32 to vector<2x32xf32>
    %94 = arith.addf %93, %92 : vector<2x32xf32>
    %95 = arith.divf %93, %94 : vector<2x32xf32>
    %96 = vector.extract_strided_slice %16 {offsets = [2, 0], sizes = [2, 32], strides = [1, 1]} : vector<16x32xf32> to vector<2x32xf32>
    %97 = arith.mulf %88, %81 : vector<2x32xf32>
    %98 = arith.addf %96, %97 : vector<2x32xf32>
    %99 = math.tanh %98 : vector<2x32xf32>
    %cst_61 = arith.constant 1.000000e+00 : f32
    %100 = vector.broadcast %cst_61 : f32 to vector<2x32xf32>
    %101 = arith.subf %100, %95 : vector<2x32xf32>
    %102 = arith.mulf %101, %99 : vector<2x32xf32>
    %103 = arith.mulf %95, %71 : vector<2x32xf32>
    %104 = arith.addf %102, %103 : vector<2x32xf32>
    %105 = arith.truncf %104 : vector<2x32xf32> to vector<2x32xbf16>
    %c0_62 = arith.constant 0 : index
    %c0_63 = arith.constant 0 : index
    %106 = vector.load %arg8[%c0_62, %c0_63] : memref<32x32xbf16, #tpu.memory_space<vmem>>, vector<32x32xbf16>
    %cst_64 = arith.constant dense<0.000000e+00> : vector<2x32xf32>
    %107 = tpu.matmul %105, %106, %cst_64 {dimension_numbers = #tpu.dot_dimension_numbers<[1], [0], [0], [1], [0, 0, 1, 1], [], []>} : vector<2x32xbf16>, vector<32x32xbf16>, vector<2x32xf32> -> vector<2x32xf32>
    %c0_65 = arith.constant 0 : index
    %c0_66 = arith.constant 0 : index
    %108 = vector.load %arg9[%c0_65, %c0_66] : memref<32x32xbf16, #tpu.memory_space<vmem>>, vector<32x32xbf16>
    %cst_67 = arith.constant dense<0.000000e+00> : vector<2x32xf32>
    %109 = tpu.matmul %105, %108, %cst_67 {dimension_numbers = #tpu.dot_dimension_numbers<[1], [0], [0], [1], [0, 0, 1, 1], [], []>} : vector<2x32xbf16>, vector<32x32xbf16>, vector<2x32xf32> -> vector<2x32xf32>
    %c0_68 = arith.constant 0 : index
    %c0_69 = arith.constant 0 : index
    %110 = vector.load %arg10[%c0_68, %c0_69] : memref<32x32xbf16, #tpu.memory_space<vmem>>, vector<32x32xbf16>
    %cst_70 = arith.constant dense<0.000000e+00> : vector<2x32xf32>
    %111 = tpu.matmul %105, %110, %cst_70 {dimension_numbers = #tpu.dot_dimension_numbers<[1], [0], [0], [1], [0, 0, 1, 1], [], []>} : vector<2x32xbf16>, vector<32x32xbf16>, vector<2x32xf32> -> vector<2x32xf32>
    %c0_71 = arith.constant 0 : index
    %c0_72 = arith.constant 0 : index
    %112 = vector.load %arg11[%c0_71, %c0_72] : memref<1x32xf32, #tpu.memory_space<vmem>>, vector<1x32xf32>
    %113 = vector.broadcast %112 : vector<1x32xf32> to vector<2x32xf32>
    %114 = arith.addf %111, %113 : vector<2x32xf32>
    %115 = vector.extract_strided_slice %6 {offsets = [4, 0], sizes = [2, 32], strides = [1, 1]} : vector<16x32xf32> to vector<2x32xf32>
    %116 = arith.addf %115, %107 : vector<2x32xf32>
    %117 = arith.negf %116 : vector<2x32xf32>
    %118 = math.exp %117 : vector<2x32xf32>
    %cst_73 = arith.constant 1.000000e+00 : f32
    %119 = vector.broadcast %cst_73 : f32 to vector<2x32xf32>
    %120 = arith.addf %119, %118 : vector<2x32xf32>
    %121 = arith.divf %119, %120 : vector<2x32xf32>
    %122 = vector.extract_strided_slice %11 {offsets = [4, 0], sizes = [2, 32], strides = [1, 1]} : vector<16x32xf32> to vector<2x32xf32>
    %123 = arith.addf %122, %109 : vector<2x32xf32>
    %124 = arith.negf %123 : vector<2x32xf32>
    %125 = math.exp %124 : vector<2x32xf32>
    %cst_74 = arith.constant 1.000000e+00 : f32
    %126 = vector.broadcast %cst_74 : f32 to vector<2x32xf32>
    %127 = arith.addf %126, %125 : vector<2x32xf32>
    %128 = arith.divf %126, %127 : vector<2x32xf32>
    %129 = vector.extract_strided_slice %16 {offsets = [4, 0], sizes = [2, 32], strides = [1, 1]} : vector<16x32xf32> to vector<2x32xf32>
    %130 = arith.mulf %121, %114 : vector<2x32xf32>
    %131 = arith.addf %129, %130 : vector<2x32xf32>
    %132 = math.tanh %131 : vector<2x32xf32>
    %cst_75 = arith.constant 1.000000e+00 : f32
    %133 = vector.broadcast %cst_75 : f32 to vector<2x32xf32>
    %134 = arith.subf %133, %128 : vector<2x32xf32>
    %135 = arith.mulf %134, %132 : vector<2x32xf32>
    %136 = arith.mulf %128, %104 : vector<2x32xf32>
    %137 = arith.addf %135, %136 : vector<2x32xf32>
    %138 = arith.truncf %137 : vector<2x32xf32> to vector<2x32xbf16>
    %c0_76 = arith.constant 0 : index
    %c0_77 = arith.constant 0 : index
    %139 = vector.load %arg8[%c0_76, %c0_77] : memref<32x32xbf16, #tpu.memory_space<vmem>>, vector<32x32xbf16>
    %cst_78 = arith.constant dense<0.000000e+00> : vector<2x32xf32>
    %140 = tpu.matmul %138, %139, %cst_78 {dimension_numbers = #tpu.dot_dimension_numbers<[1], [0], [0], [1], [0, 0, 1, 1], [], []>} : vector<2x32xbf16>, vector<32x32xbf16>, vector<2x32xf32> -> vector<2x32xf32>
    %c0_79 = arith.constant 0 : index
    %c0_80 = arith.constant 0 : index
    %141 = vector.load %arg9[%c0_79, %c0_80] : memref<32x32xbf16, #tpu.memory_space<vmem>>, vector<32x32xbf16>
    %cst_81 = arith.constant dense<0.000000e+00> : vector<2x32xf32>
    %142 = tpu.matmul %138, %141, %cst_81 {dimension_numbers = #tpu.dot_dimension_numbers<[1], [0], [0], [1], [0, 0, 1, 1], [], []>} : vector<2x32xbf16>, vector<32x32xbf16>, vector<2x32xf32> -> vector<2x32xf32>
    %c0_82 = arith.constant 0 : index
    %c0_83 = arith.constant 0 : index
    %143 = vector.load %arg10[%c0_82, %c0_83] : memref<32x32xbf16, #tpu.memory_space<vmem>>, vector<32x32xbf16>
    %cst_84 = arith.constant dense<0.000000e+00> : vector<2x32xf32>
    %144 = tpu.matmul %138, %143, %cst_84 {dimension_numbers = #tpu.dot_dimension_numbers<[1], [0], [0], [1], [0, 0, 1, 1], [], []>} : vector<2x32xbf16>, vector<32x32xbf16>, vector<2x32xf32> -> vector<2x32xf32>
    %c0_85 = arith.constant 0 : index
    %c0_86 = arith.constant 0 : index
    %145 = vector.load %arg11[%c0_85, %c0_86] : memref<1x32xf32, #tpu.memory_space<vmem>>, vector<1x32xf32>
    %146 = vector.broadcast %145 : vector<1x32xf32> to vector<2x32xf32>
    %147 = arith.addf %144, %146 : vector<2x32xf32>
    %148 = vector.extract_strided_slice %6 {offsets = [6, 0], sizes = [2, 32], strides = [1, 1]} : vector<16x32xf32> to vector<2x32xf32>
    %149 = arith.addf %148, %140 : vector<2x32xf32>
    %150 = arith.negf %149 : vector<2x32xf32>
    %151 = math.exp %150 : vector<2x32xf32>
    %cst_87 = arith.constant 1.000000e+00 : f32
    %152 = vector.broadcast %cst_87 : f32 to vector<2x32xf32>
    %153 = arith.addf %152, %151 : vector<2x32xf32>
    %154 = arith.divf %152, %153 : vector<2x32xf32>
    %155 = vector.extract_strided_slice %11 {offsets = [6, 0], sizes = [2, 32], strides = [1, 1]} : vector<16x32xf32> to vector<2x32xf32>
    %156 = arith.addf %155, %142 : vector<2x32xf32>
    %157 = arith.negf %156 : vector<2x32xf32>
    %158 = math.exp %157 : vector<2x32xf32>
    %cst_88 = arith.constant 1.000000e+00 : f32
    %159 = vector.broadcast %cst_88 : f32 to vector<2x32xf32>
    %160 = arith.addf %159, %158 : vector<2x32xf32>
    %161 = arith.divf %159, %160 : vector<2x32xf32>
    %162 = vector.extract_strided_slice %16 {offsets = [6, 0], sizes = [2, 32], strides = [1, 1]} : vector<16x32xf32> to vector<2x32xf32>
    %163 = arith.mulf %154, %147 : vector<2x32xf32>
    %164 = arith.addf %162, %163 : vector<2x32xf32>
    %165 = math.tanh %164 : vector<2x32xf32>
    %cst_89 = arith.constant 1.000000e+00 : f32
    %166 = vector.broadcast %cst_89 : f32 to vector<2x32xf32>
    %167 = arith.subf %166, %161 : vector<2x32xf32>
    %168 = arith.mulf %167, %165 : vector<2x32xf32>
    %169 = arith.mulf %161, %137 : vector<2x32xf32>
    %170 = arith.addf %168, %169 : vector<2x32xf32>
    %171 = arith.truncf %170 : vector<2x32xf32> to vector<2x32xbf16>
    %c0_90 = arith.constant 0 : index
    %c0_91 = arith.constant 0 : index
    %172 = vector.load %arg8[%c0_90, %c0_91] : memref<32x32xbf16, #tpu.memory_space<vmem>>, vector<32x32xbf16>
    %cst_92 = arith.constant dense<0.000000e+00> : vector<2x32xf32>
    %173 = tpu.matmul %171, %172, %cst_92 {dimension_numbers = #tpu.dot_dimension_numbers<[1], [0], [0], [1], [0, 0, 1, 1], [], []>} : vector<2x32xbf16>, vector<32x32xbf16>, vector<2x32xf32> -> vector<2x32xf32>
    %c0_93 = arith.constant 0 : index
    %c0_94 = arith.constant 0 : index
    %174 = vector.load %arg9[%c0_93, %c0_94] : memref<32x32xbf16, #tpu.memory_space<vmem>>, vector<32x32xbf16>
    %cst_95 = arith.constant dense<0.000000e+00> : vector<2x32xf32>
    %175 = tpu.matmul %171, %174, %cst_95 {dimension_numbers = #tpu.dot_dimension_numbers<[1], [0], [0], [1], [0, 0, 1, 1], [], []>} : vector<2x32xbf16>, vector<32x32xbf16>, vector<2x32xf32> -> vector<2x32xf32>
    %c0_96 = arith.constant 0 : index
    %c0_97 = arith.constant 0 : index
    %176 = vector.load %arg10[%c0_96, %c0_97] : memref<32x32xbf16, #tpu.memory_space<vmem>>, vector<32x32xbf16>
    %cst_98 = arith.constant dense<0.000000e+00> : vector<2x32xf32>
    %177 = tpu.matmul %171, %176, %cst_98 {dimension_numbers = #tpu.dot_dimension_numbers<[1], [0], [0], [1], [0, 0, 1, 1], [], []>} : vector<2x32xbf16>, vector<32x32xbf16>, vector<2x32xf32> -> vector<2x32xf32>
    %c0_99 = arith.constant 0 : index
    %c0_100 = arith.constant 0 : index
    %178 = vector.load %arg11[%c0_99, %c0_100] : memref<1x32xf32, #tpu.memory_space<vmem>>, vector<1x32xf32>
    %179 = vector.broadcast %178 : vector<1x32xf32> to vector<2x32xf32>
    %180 = arith.addf %177, %179 : vector<2x32xf32>
    %181 = vector.extract_strided_slice %6 {offsets = [8, 0], sizes = [2, 32], strides = [1, 1]} : vector<16x32xf32> to vector<2x32xf32>
    %182 = arith.addf %181, %173 : vector<2x32xf32>
    %183 = arith.negf %182 : vector<2x32xf32>
    %184 = math.exp %183 : vector<2x32xf32>
    %cst_101 = arith.constant 1.000000e+00 : f32
    %185 = vector.broadcast %cst_101 : f32 to vector<2x32xf32>
    %186 = arith.addf %185, %184 : vector<2x32xf32>
    %187 = arith.divf %185, %186 : vector<2x32xf32>
    %188 = vector.extract_strided_slice %11 {offsets = [8, 0], sizes = [2, 32], strides = [1, 1]} : vector<16x32xf32> to vector<2x32xf32>
    %189 = arith.addf %188, %175 : vector<2x32xf32>
    %190 = arith.negf %189 : vector<2x32xf32>
    %191 = math.exp %190 : vector<2x32xf32>
    %cst_102 = arith.constant 1.000000e+00 : f32
    %192 = vector.broadcast %cst_102 : f32 to vector<2x32xf32>
    %193 = arith.addf %192, %191 : vector<2x32xf32>
    %194 = arith.divf %192, %193 : vector<2x32xf32>
    %195 = vector.extract_strided_slice %16 {offsets = [8, 0], sizes = [2, 32], strides = [1, 1]} : vector<16x32xf32> to vector<2x32xf32>
    %196 = arith.mulf %187, %180 : vector<2x32xf32>
    %197 = arith.addf %195, %196 : vector<2x32xf32>
    %198 = math.tanh %197 : vector<2x32xf32>
    %cst_103 = arith.constant 1.000000e+00 : f32
    %199 = vector.broadcast %cst_103 : f32 to vector<2x32xf32>
    %200 = arith.subf %199, %194 : vector<2x32xf32>
    %201 = arith.mulf %200, %198 : vector<2x32xf32>
    %202 = arith.mulf %194, %170 : vector<2x32xf32>
    %203 = arith.addf %201, %202 : vector<2x32xf32>
    %204 = arith.truncf %203 : vector<2x32xf32> to vector<2x32xbf16>
    %c0_104 = arith.constant 0 : index
    %c0_105 = arith.constant 0 : index
    %205 = vector.load %arg8[%c0_104, %c0_105] : memref<32x32xbf16, #tpu.memory_space<vmem>>, vector<32x32xbf16>
    %cst_106 = arith.constant dense<0.000000e+00> : vector<2x32xf32>
    %206 = tpu.matmul %204, %205, %cst_106 {dimension_numbers = #tpu.dot_dimension_numbers<[1], [0], [0], [1], [0, 0, 1, 1], [], []>} : vector<2x32xbf16>, vector<32x32xbf16>, vector<2x32xf32> -> vector<2x32xf32>
    %c0_107 = arith.constant 0 : index
    %c0_108 = arith.constant 0 : index
    %207 = vector.load %arg9[%c0_107, %c0_108] : memref<32x32xbf16, #tpu.memory_space<vmem>>, vector<32x32xbf16>
    %cst_109 = arith.constant dense<0.000000e+00> : vector<2x32xf32>
    %208 = tpu.matmul %204, %207, %cst_109 {dimension_numbers = #tpu.dot_dimension_numbers<[1], [0], [0], [1], [0, 0, 1, 1], [], []>} : vector<2x32xbf16>, vector<32x32xbf16>, vector<2x32xf32> -> vector<2x32xf32>
    %c0_110 = arith.constant 0 : index
    %c0_111 = arith.constant 0 : index
    %209 = vector.load %arg10[%c0_110, %c0_111] : memref<32x32xbf16, #tpu.memory_space<vmem>>, vector<32x32xbf16>
    %cst_112 = arith.constant dense<0.000000e+00> : vector<2x32xf32>
    %210 = tpu.matmul %204, %209, %cst_112 {dimension_numbers = #tpu.dot_dimension_numbers<[1], [0], [0], [1], [0, 0, 1, 1], [], []>} : vector<2x32xbf16>, vector<32x32xbf16>, vector<2x32xf32> -> vector<2x32xf32>
    %c0_113 = arith.constant 0 : index
    %c0_114 = arith.constant 0 : index
    %211 = vector.load %arg11[%c0_113, %c0_114] : memref<1x32xf32, #tpu.memory_space<vmem>>, vector<1x32xf32>
    %212 = vector.broadcast %211 : vector<1x32xf32> to vector<2x32xf32>
    %213 = arith.addf %210, %212 : vector<2x32xf32>
    %214 = vector.extract_strided_slice %6 {offsets = [10, 0], sizes = [2, 32], strides = [1, 1]} : vector<16x32xf32> to vector<2x32xf32>
    %215 = arith.addf %214, %206 : vector<2x32xf32>
    %216 = arith.negf %215 : vector<2x32xf32>
    %217 = math.exp %216 : vector<2x32xf32>
    %cst_115 = arith.constant 1.000000e+00 : f32
    %218 = vector.broadcast %cst_115 : f32 to vector<2x32xf32>
    %219 = arith.addf %218, %217 : vector<2x32xf32>
    %220 = arith.divf %218, %219 : vector<2x32xf32>
    %221 = vector.extract_strided_slice %11 {offsets = [10, 0], sizes = [2, 32], strides = [1, 1]} : vector<16x32xf32> to vector<2x32xf32>
    %222 = arith.addf %221, %208 : vector<2x32xf32>
    %223 = arith.negf %222 : vector<2x32xf32>
    %224 = math.exp %223 : vector<2x32xf32>
    %cst_116 = arith.constant 1.000000e+00 : f32
    %225 = vector.broadcast %cst_116 : f32 to vector<2x32xf32>
    %226 = arith.addf %225, %224 : vector<2x32xf32>
    %227 = arith.divf %225, %226 : vector<2x32xf32>
    %228 = vector.extract_strided_slice %16 {offsets = [10, 0], sizes = [2, 32], strides = [1, 1]} : vector<16x32xf32> to vector<2x32xf32>
    %229 = arith.mulf %220, %213 : vector<2x32xf32>
    %230 = arith.addf %228, %229 : vector<2x32xf32>
    %231 = math.tanh %230 : vector<2x32xf32>
    %cst_117 = arith.constant 1.000000e+00 : f32
    %232 = vector.broadcast %cst_117 : f32 to vector<2x32xf32>
    %233 = arith.subf %232, %227 : vector<2x32xf32>
    %234 = arith.mulf %233, %231 : vector<2x32xf32>
    %235 = arith.mulf %227, %203 : vector<2x32xf32>
    %236 = arith.addf %234, %235 : vector<2x32xf32>
    %237 = arith.truncf %236 : vector<2x32xf32> to vector<2x32xbf16>
    %c0_118 = arith.constant 0 : index
    %c0_119 = arith.constant 0 : index
    %238 = vector.load %arg8[%c0_118, %c0_119] : memref<32x32xbf16, #tpu.memory_space<vmem>>, vector<32x32xbf16>
    %cst_120 = arith.constant dense<0.000000e+00> : vector<2x32xf32>
    %239 = tpu.matmul %237, %238, %cst_120 {dimension_numbers = #tpu.dot_dimension_numbers<[1], [0], [0], [1], [0, 0, 1, 1], [], []>} : vector<2x32xbf16>, vector<32x32xbf16>, vector<2x32xf32> -> vector<2x32xf32>
    %c0_121 = arith.constant 0 : index
    %c0_122 = arith.constant 0 : index
    %240 = vector.load %arg9[%c0_121, %c0_122] : memref<32x32xbf16, #tpu.memory_space<vmem>>, vector<32x32xbf16>
    %cst_123 = arith.constant dense<0.000000e+00> : vector<2x32xf32>
    %241 = tpu.matmul %237, %240, %cst_123 {dimension_numbers = #tpu.dot_dimension_numbers<[1], [0], [0], [1], [0, 0, 1, 1], [], []>} : vector<2x32xbf16>, vector<32x32xbf16>, vector<2x32xf32> -> vector<2x32xf32>
    %c0_124 = arith.constant 0 : index
    %c0_125 = arith.constant 0 : index
    %242 = vector.load %arg10[%c0_124, %c0_125] : memref<32x32xbf16, #tpu.memory_space<vmem>>, vector<32x32xbf16>
    %cst_126 = arith.constant dense<0.000000e+00> : vector<2x32xf32>
    %243 = tpu.matmul %237, %242, %cst_126 {dimension_numbers = #tpu.dot_dimension_numbers<[1], [0], [0], [1], [0, 0, 1, 1], [], []>} : vector<2x32xbf16>, vector<32x32xbf16>, vector<2x32xf32> -> vector<2x32xf32>
    %c0_127 = arith.constant 0 : index
    %c0_128 = arith.constant 0 : index
    %244 = vector.load %arg11[%c0_127, %c0_128] : memref<1x32xf32, #tpu.memory_space<vmem>>, vector<1x32xf32>
    %245 = vector.broadcast %244 : vector<1x32xf32> to vector<2x32xf32>
    %246 = arith.addf %243, %245 : vector<2x32xf32>
    %247 = vector.extract_strided_slice %6 {offsets = [12, 0], sizes = [2, 32], strides = [1, 1]} : vector<16x32xf32> to vector<2x32xf32>
    %248 = arith.addf %247, %239 : vector<2x32xf32>
    %249 = arith.negf %248 : vector<2x32xf32>
    %250 = math.exp %249 : vector<2x32xf32>
    %cst_129 = arith.constant 1.000000e+00 : f32
    %251 = vector.broadcast %cst_129 : f32 to vector<2x32xf32>
    %252 = arith.addf %251, %250 : vector<2x32xf32>
    %253 = arith.divf %251, %252 : vector<2x32xf32>
    %254 = vector.extract_strided_slice %11 {offsets = [12, 0], sizes = [2, 32], strides = [1, 1]} : vector<16x32xf32> to vector<2x32xf32>
    %255 = arith.addf %254, %241 : vector<2x32xf32>
    %256 = arith.negf %255 : vector<2x32xf32>
    %257 = math.exp %256 : vector<2x32xf32>
    %cst_130 = arith.constant 1.000000e+00 : f32
    %258 = vector.broadcast %cst_130 : f32 to vector<2x32xf32>
    %259 = arith.addf %258, %257 : vector<2x32xf32>
    %260 = arith.divf %258, %259 : vector<2x32xf32>
    %261 = vector.extract_strided_slice %16 {offsets = [12, 0], sizes = [2, 32], strides = [1, 1]} : vector<16x32xf32> to vector<2x32xf32>
    %262 = arith.mulf %253, %246 : vector<2x32xf32>
    %263 = arith.addf %261, %262 : vector<2x32xf32>
    %264 = math.tanh %263 : vector<2x32xf32>
    %cst_131 = arith.constant 1.000000e+00 : f32
    %265 = vector.broadcast %cst_131 : f32 to vector<2x32xf32>
    %266 = arith.subf %265, %260 : vector<2x32xf32>
    %267 = arith.mulf %266, %264 : vector<2x32xf32>
    %268 = arith.mulf %260, %236 : vector<2x32xf32>
    %269 = arith.addf %267, %268 : vector<2x32xf32>
    %270 = arith.truncf %269 : vector<2x32xf32> to vector<2x32xbf16>
    %c0_132 = arith.constant 0 : index
    %c0_133 = arith.constant 0 : index
    %271 = vector.load %arg8[%c0_132, %c0_133] : memref<32x32xbf16, #tpu.memory_space<vmem>>, vector<32x32xbf16>
    %cst_134 = arith.constant dense<0.000000e+00> : vector<2x32xf32>
    %272 = tpu.matmul %270, %271, %cst_134 {dimension_numbers = #tpu.dot_dimension_numbers<[1], [0], [0], [1], [0, 0, 1, 1], [], []>} : vector<2x32xbf16>, vector<32x32xbf16>, vector<2x32xf32> -> vector<2x32xf32>
    %c0_135 = arith.constant 0 : index
    %c0_136 = arith.constant 0 : index
    %273 = vector.load %arg9[%c0_135, %c0_136] : memref<32x32xbf16, #tpu.memory_space<vmem>>, vector<32x32xbf16>
    %cst_137 = arith.constant dense<0.000000e+00> : vector<2x32xf32>
    %274 = tpu.matmul %270, %273, %cst_137 {dimension_numbers = #tpu.dot_dimension_numbers<[1], [0], [0], [1], [0, 0, 1, 1], [], []>} : vector<2x32xbf16>, vector<32x32xbf16>, vector<2x32xf32> -> vector<2x32xf32>
    %c0_138 = arith.constant 0 : index
    %c0_139 = arith.constant 0 : index
    %275 = vector.load %arg10[%c0_138, %c0_139] : memref<32x32xbf16, #tpu.memory_space<vmem>>, vector<32x32xbf16>
    %cst_140 = arith.constant dense<0.000000e+00> : vector<2x32xf32>
    %276 = tpu.matmul %270, %275, %cst_140 {dimension_numbers = #tpu.dot_dimension_numbers<[1], [0], [0], [1], [0, 0, 1, 1], [], []>} : vector<2x32xbf16>, vector<32x32xbf16>, vector<2x32xf32> -> vector<2x32xf32>
    %c0_141 = arith.constant 0 : index
    %c0_142 = arith.constant 0 : index
    %277 = vector.load %arg11[%c0_141, %c0_142] : memref<1x32xf32, #tpu.memory_space<vmem>>, vector<1x32xf32>
    %278 = vector.broadcast %277 : vector<1x32xf32> to vector<2x32xf32>
    %279 = arith.addf %276, %278 : vector<2x32xf32>
    %280 = vector.extract_strided_slice %6 {offsets = [14, 0], sizes = [2, 32], strides = [1, 1]} : vector<16x32xf32> to vector<2x32xf32>
    %281 = arith.addf %280, %272 : vector<2x32xf32>
    %282 = arith.negf %281 : vector<2x32xf32>
    %283 = math.exp %282 : vector<2x32xf32>
    %cst_143 = arith.constant 1.000000e+00 : f32
    %284 = vector.broadcast %cst_143 : f32 to vector<2x32xf32>
    %285 = arith.addf %284, %283 : vector<2x32xf32>
    %286 = arith.divf %284, %285 : vector<2x32xf32>
    %287 = vector.extract_strided_slice %11 {offsets = [14, 0], sizes = [2, 32], strides = [1, 1]} : vector<16x32xf32> to vector<2x32xf32>
    %288 = arith.addf %287, %274 : vector<2x32xf32>
    %289 = arith.negf %288 : vector<2x32xf32>
    %290 = math.exp %289 : vector<2x32xf32>
    %cst_144 = arith.constant 1.000000e+00 : f32
    %291 = vector.broadcast %cst_144 : f32 to vector<2x32xf32>
    %292 = arith.addf %291, %290 : vector<2x32xf32>
    %293 = arith.divf %291, %292 : vector<2x32xf32>
    %294 = vector.extract_strided_slice %16 {offsets = [14, 0], sizes = [2, 32], strides = [1, 1]} : vector<16x32xf32> to vector<2x32xf32>
    %295 = arith.mulf %286, %279 : vector<2x32xf32>
    %296 = arith.addf %294, %295 : vector<2x32xf32>
    %297 = math.tanh %296 : vector<2x32xf32>
    %cst_145 = arith.constant 1.000000e+00 : f32
    %298 = vector.broadcast %cst_145 : f32 to vector<2x32xf32>
    %299 = arith.subf %298, %293 : vector<2x32xf32>
    %300 = arith.mulf %299, %297 : vector<2x32xf32>
    %301 = arith.mulf %293, %269 : vector<2x32xf32>
    %302 = arith.addf %300, %301 : vector<2x32xf32>
    %303 = tpu.concatenate %71, %104, %137, %170, %203, %236, %269, %302 in 0 : vector<2x32xf32>, vector<2x32xf32>, vector<2x32xf32>, vector<2x32xf32>, vector<2x32xf32>, vector<2x32xf32>, vector<2x32xf32>, vector<2x32xf32> -> vector<16x32xf32>
    %304 = tpu.concatenate %37, %37, %37, %37, %37, %37, %37, %37 in 0 : vector<2x64xf32>, vector<2x64xf32>, vector<2x64xf32>, vector<2x64xf32>, vector<2x64xf32>, vector<2x64xf32>, vector<2x64xf32>, vector<2x64xf32> -> vector<16x64xf32>
    %305 = arith.truncf %303 : vector<16x32xf32> to vector<16x32xbf16>
    %c0_146 = arith.constant 0 : index
    %c0_147 = arith.constant 0 : index
    %306 = vector.load %arg16[%c0_146, %c0_147] : memref<32x64xbf16, #tpu.memory_space<vmem>>, vector<32x64xbf16>
    %cst_148 = arith.constant dense<0.000000e+00> : vector<16x64xf32>
    %307 = tpu.matmul %305, %306, %cst_148 {dimension_numbers = #tpu.dot_dimension_numbers<[1], [0], [0], [1], [0, 0, 1, 1], [], []>} : vector<16x32xbf16>, vector<32x64xbf16>, vector<16x64xf32> -> vector<16x64xf32>
    %308 = arith.addf %307, %304 : vector<16x64xf32>
    %cst_149 = arith.constant 0.000000e+00 : f32
    %309 = vector.broadcast %cst_149 : f32 to vector<16x64xf32>
    %310 = arith.maximumf %308, %309 : vector<16x64xf32>
    %311 = arith.truncf %310 : vector<16x64xf32> to vector<16x64xbf16>
    %c0_150 = arith.constant 0 : index
    %c0_151 = arith.constant 0 : index
    %312 = vector.load %arg19[%c0_150, %c0_151] : memref<64x128xbf16, #tpu.memory_space<vmem>>, vector<64x128xbf16>
    %cst_152 = arith.constant dense<0.000000e+00> : vector<16x128xf32>
    %313 = tpu.matmul %311, %312, %cst_152 {dimension_numbers = #tpu.dot_dimension_numbers<[1], [0], [0], [1], [0, 0, 1, 1], [], []>} : vector<16x64xbf16>, vector<64x128xbf16>, vector<16x128xf32> -> vector<16x128xf32>
    %c0_153 = arith.constant 0 : index
    %c0_154 = arith.constant 0 : index
    %314 = vector.load %arg20[%c0_153, %c0_154] : memref<1x128xf32, #tpu.memory_space<vmem>>, vector<1x128xf32>
    %315 = vector.broadcast %314 : vector<1x128xf32> to vector<16x128xf32>
    %316 = arith.addf %313, %315 : vector<16x128xf32>
    %cst_155 = arith.constant dense<0xFF800000> : vector<16xf32>
    %317 = vector.multi_reduction <maximumf>, %316, %cst_155 [1] : vector<16x128xf32> to vector<16xf32>
    %318 = vector.shape_cast %317 : vector<16xf32> to vector<16x1xf32>
    %319 = vector.broadcast %318 : vector<16x1xf32> to vector<16x128xf32>
    %320 = arith.subf %316, %319 : vector<16x128xf32>
    %321 = math.exp %320 : vector<16x128xf32>
    %cst_156 = arith.constant dense<0.000000e+00> : vector<16xf32>
    %322 = vector.multi_reduction <add>, %321, %cst_156 [1] : vector<16x128xf32> to vector<16xf32>
    %323 = vector.shape_cast %322 : vector<16xf32> to vector<16x1xf32>
    %324 = math.log %323 : vector<16x1xf32>
    %325 = arith.addf %318, %324 : vector<16x1xf32>
    %326 = vector.broadcast %325 : vector<16x1xf32> to vector<16x128xf32>
    %327 = arith.subf %316, %326 : vector<16x128xf32>
    %c0_157 = arith.constant 0 : index
    %c0_158 = arith.constant 0 : index
    %328 = vector.load %arg21[%c0_157, %c0_158] : memref<16x128xf32, #tpu.memory_space<vmem>>, vector<16x128xf32>
    tpu.vector_store %arg21[%c0_157, %c0_158], %327 {strides = array<i32>} : memref<16x128xf32, #tpu.memory_space<vmem>>, vector<16x128xf32>,
    return
  }
}

</mosaic_0001>

<bundles_post_ra>
// kernel: fv_behavior_forward.1
= control target key start
LH: loop header
LB: loop body
LE: loop exit
PB: predicated region body
PF: predicated region fallthrough
CT: control target
= control target key end

     0   :  { %v2796_v1 = vmov 0   ;;  %v2797_v2 = vmov 0.0   ;;  %vm2798_vm0 = vmmov 0   ;;  %vm87_vm1 = vcmask 130048   ;;  %s3416_s12 = inlined_call_operand.vmem [shape: bf16[97,256], index: 12, kind: input, shape index: {}]   ;;  %s3417_s2 = inlined_call_operand.vmem [shape: bf16[16,32], index: 2, kind: input, shape index: {}]   ;;  %s3418_s0 = inlined_call_operand.vmem [shape: f32[16,16], index: 0, kind: input, shape index: {}]   ;;  %s3419_s3 = inlined_call_operand.vmem [shape: bf16[16,32], index: 3, kind: input, shape index: {}]   ;;  %s3420_s4 = inlined_call_operand.vmem [shape: bf16[16,32], index: 4, kind: input, shape index: {}]   ;;  %s3421_s14 = inlined_call_operand.vmem [shape: bf16[256,128], index: 14, kind: input, shape index: {}]   ;;  %s3422_s1 = inlined_call_operand.vmem [shape: f32[2,97], index: 1, kind: input, shape index: {}]   ;;  %s3423_s8 = inlined_call_operand.vmem [shape: bf16[32,32], index: 8, kind: input, shape index: {}]   ;;  %s3424_s9 = inlined_call_operand.vmem [shape: bf16[32,32], index: 9, kind: input, shape index: {}]   ;;  %s3425_s10 = inlined_call_operand.vmem [shape: bf16[32,32], index: 10, kind: input, shape index: {}]   ;;  %s3426_s17 = inlined_call_operand.vmem [shape: bf16[128,64], index: 17, kind: input, shape index: {}]   ;;  %s3427_s5 = inlined_call_operand.vmem [shape: f32[1,32], index: 5, kind: input, shape index: {}]   ;;  %s3428_s6 = inlined_call_operand.vmem [shape: f32[1,32], index: 6, kind: input, shape index: {}]   ;;  %s3429_s13 = inlined_call_operand.vmem [shape: f32[1,256], index: 13, kind: input, shape index: {}]   ;;  %s3430_s7 = inlined_call_operand.vmem [shape: f32[1,32], index: 7, kind: input, shape index: {}]   ;;  %s3431_s15 = inlined_call_operand.vmem [shape: f32[1,128], index: 15, kind: input, shape index: {}]   ;;  %s3432_s11 = inlined_call_operand.vmem [shape: f32[1,32], index: 11, kind: input, shape index: {}]   ;;  %s3433_s16 = inlined_call_operand.vmem [shape: bf16[32,64], index: 16, kind: input, shape index: {}]   ;;  %s3434_s19 = inlined_call_operand.vmem [shape: bf16[64,128], index: 19, kind: input, shape index: {}]   ;;  %s3435_s18 = inlined_call_operand.vmem [shape: f32[1,64], index: 18, kind: input, shape index: {}]   ;;  %s3436_s20 = inlined_call_operand.vmem [shape: f32[1,128], index: 20, kind: input, shape index: {}]   ;;  %s3437_s21 = inlined_call_operand.vmem [shape: f32[16,128], index: 21, kind: output, shape index: {}]  }
   0x1   :  { %3441 = sst [smem:[#allocation2_spill]] %s3416_s12  ;;  %381 = vmatprep.mubr.bf16.mxu1 %v2796_v1  ;;  %2396 = vmatprep.subr.bf16.mxu0 %v2797_v2  ;;  %vm340_vm2 = vcmask 1040384   ;;  %v244_v27 = vld [vmem:[%s3422_s1] sm:$0x3]  ;;  %vm336_vm3 = vcmask 793600   ;;  %v2695_v45 = vld [vmem:[%s3426_s17 + $0x8] sm:$0xff]   ;;  %v261_v52 = vlaneseq }
   0x2   :  { %3442 = sst [smem:[#allocation3_spill]] %s3417_s2  ;;  %s3447_s26 = sld [smem:[#allocation2_spill]]  ;;  %2398 = vmatprep.mubr.msk.bf16.mxu0 %vm2798_vm0, %v2797_v2  ;;  %v342_v20 = vsel %vm340_vm2, 65535, %v2796_v1  ;;  %v245_v28 = vpack.c.bf16 %v244_v27, %v244_v27  ;;  %v2694_v44 = vld [vmem:[%s3426_s17] sm:$0xff]   ;;  %v2696_v46 = vld [vmem:[%s3426_s17 + $0x10] sm:$0xff]   ;;  %v2697_v47 = vld [vmem:[%s3426_s17 + $0x18] sm:$0xff]  }
   0x3   :  { %3443 = sst [smem:[#allocation4_spill]] %s3418_s0  ;;  %s3448_s28 = sld [smem:[#allocation3_spill]]  ;;  %v2698_v48 = vld [vmem:[%s3426_s17 + $0x20] sm:$0xff]   ;;  %v2699_v49 = vld [vmem:[%s3426_s17 + $0x28] sm:$0xff]   ;;  %v262_v57 = vshrl.u32 %v261_v52, 7  ;;  %vm697_vm4 = vcmask 261120  }
   0x4   :  { %3444 = sst [smem:[#allocation5_spill]] %s3419_s3  ;;  %s3449_s12 = sld [smem:[#allocation4_spill]]  ;;  %v3059_v50 = vld [vmem:[%s3427_s5] ss:$0 sm:$0xff]  ;;  %vm1981_vm5 = vcmask 1041408   ;;  %vm1983_vm6 = vcmask 1043456  }
   0x5   :  { %3445 = sst [smem:[#allocation6_spill]] %s3420_s4  ;;  %s3450_s2 = sld [smem:[#allocation5_spill]]  ;;  %v3069_v58 = vld [vmem:[%s3428_s6] ss:$0 sm:$0xff]  ;;  %v263_v60 = vsub.s32 0, %v262_v57  ;;  %v267_v63 = vsub.s32 1, %v262_v57 }
   0x6   :  { %3446 = sst [smem:[#allocation7_spill]] %s3421_s14  ;;  %s3451_s23 = sld [smem:[#allocation6_spill]]  ;;  %v259_v62 = vld [vmem:[%s3429_s13] sm:$0x3]  ;;  %vm1985_vm7 = vcmask 1045504   ;;  %vm2103_vm8 = vcmask 523264  }
   0x7   :  { %s3452_s0 = sld [smem:[#allocation7_spill]]  ;;  %v3124_v27 = vld [vmem:[%s3425_s10] sm:$0xff]  }
   0x8   :  { %v2649_v0 = vld [vmem:[%s3447_s26 + $0x4] ss:$8 sps:$4 sm:$0xff]   ;;  %v2651_v3 = vld [vmem:[%s3447_s26] ss:$8 sps:$4 sm:$0xff]   ;;  %v2652_v4 = vld [vmem:[%s3447_s26 + $0x14] ss:$8 sps:$4 sm:$0xff]  }
   0x9   :  { %349 = vmatprep.subr.bf16.mxu1 %v2649_v0  ;;  %v2654_v5 = vld [vmem:[%s3447_s26 + $0x10] ss:$8 sps:$4 sm:$0xff]   ;;  %v2655_v6 = vld [vmem:[%s3447_s26 + $0x24] ss:$8 sps:$4 sm:$0xff]   ;;  %v2657_v7 = vld [vmem:[%s3447_s26 + $0x20] ss:$8 sps:$4 sm:$0xff]  }
   0xa   :  { %350 = vmatpush1.bf16.msra.mxu1 %v2651_v3  ;;  %v2658_v8 = vld [vmem:[%s3447_s26 + $0x34] ss:$8 sps:$4 sm:$0xff]   ;;  %v2660_v9 = vld [vmem:[%s3447_s26 + $0x30] ss:$8 sps:$4 sm:$0xff]   ;;  %v2669_v10 = vld [vmem:[%s3448_s28] sm:$0xff]  }
   0xb   :  { %351 = vmatprep.subr.bf16.mxu1 %v2652_v4  ;;  %v69_v11 = vld [vmem:[%s3449_s12] sm:$0xff]  ;;  %v70_v12 = vld [vmem:[%s3449_s12 + $0x8] sm:$0xff]  ;;  %2397 = vmatpush3.bf16.msra.mxu0 %v2669_v10  ;;  %v2664_v18 = vld [vmem:[%s3447_s26 + $0x54] ss:$8 sps:$4 sm:$0xff]  }
   0xc   :  { %v71_v13 = vpack.c.bf16 %v70_v12, %v69_v11  ;;  %v2670_v14 = vld [vmem:[%s3450_s2] sm:$0xff]   ;;  %2402 = vmatprep.subr.bf16.mxu0 %v2797_v2  ;;  %v2666_v21 = vld [vmem:[%s3447_s26 + $0x50] ss:$8 sps:$4 sm:$0xff]  }
   0xd   :  { %v2661_v15 = vld [vmem:[%s3447_s26 + $0x44] ss:$8 sps:$4 sm:$0xff]   ;;  %v2663_v17 = vld [vmem:[%s3447_s26 + $0x40] ss:$8 sps:$4 sm:$0xff]   ;;  %v2676_v32 = vld [vmem:[%s3452_s0 + $0x50] sm:$0xff]  }
   0xe   :  { %352 = vmatpush1.bf16.msra.mxu1 %v2654_v5  ;;  %v258_v16 = vld [vmem:[%s3447_s26 + $0x60] sm:$0x11]  ;;  %2399 = vmatmul.mubr.msk.bf16.vlgmr.msra.gmra.mrb[0].mxu0 %vm87_vm1, %v71_v13  ;;  %v2674_v30 = vld [vmem:[%s3452_s0 + $0x48] sm:$0xff]   ;;  %v2677_v33 = vld [vmem:[%s3452_s0 + $0x10] sm:$0xff]   ;;  %v264_v5 = vrot.slane %v259_v62, %v263_v60 }
   0xf   :  { %353 = vmatprep.subr.bf16.mxu1 %v2655_v6  ;;  %2403 = vmatpush3.bf16.msra.mxu0 %v2670_v14  ;;  %v2198_v19 = vcombine.high %v258_v16, %v258_v16  ;;  %v2197_v22 = vcombine.low %v258_v16, %v258_v16  ;;  %v2671_v23 = vld [vmem:[%s3451_s23] sm:$0xff]   ;;  %v2675_v31 = vld [vmem:[%s3452_s0 + $0x8] sm:$0xff]   ;;  %v2678_v34 = vld [vmem:[%s3452_s0 + $0x58] sm:$0xff]   ;;  %v268_v6 = vrot.slane %v259_v62, %v267_v63 }
  0x10   :  { %2404 = vmatprep.mubr.msk.bf16.mxu0 %vm2798_vm0, %v2797_v2  ;;  %2408 = vmatprep.subr.bf16.mxu0 %v2797_v2  ;;  %v2672_v25 = vld [vmem:[%s3452_s0 + $0x40] sm:$0xff]   ;;  %v2679_v35 = vld [vmem:[%s3452_s0 + $0x18] sm:$0xff]   ;;  %v2682_v38 = vld [vmem:[%s3452_s0 + $0x68] sm:$0xff]  }
  0x11   :  { %v347_v24 = vand.u32 %v2198_v19, %v342_v20  ;;  %v344_v26 = vand.u32 %v2197_v22, %v342_v20  ;;  %v2673_v29 = vld [vmem:[%s3452_s0] sm:$0xff]   ;;  %v2683_v39 = vld [vmem:[%s3452_s0 + $0x28] sm:$0xff]   ;;  %v2684_v40 = vld [vmem:[%s3452_s0 + $0x70] sm:$0xff]  }
  0x12   :  { %354 = vmatpush1.bf16.msra.mxu1 %v2657_v7  ;;  %v2680_v36 = vld [vmem:[%s3452_s0 + $0x60] sm:$0xff]   ;;  %v2685_v41 = vld [vmem:[%s3452_s0 + $0x30] sm:$0xff]   ;;  %v2686_v42 = vld [vmem:[%s3452_s0 + $0x78] sm:$0xff]  }
  0x13   :  { %355 = vmatprep.subr.bf16.mxu1 %v2658_v8  ;;  %v2681_v37 = vld [vmem:[%s3452_s0 + $0x20] sm:$0xff]   ;;  %v2687_v43 = vld [vmem:[%s3452_s0 + $0x38] sm:$0xff]  }
  0x14   :  { %v3082_v8 = vld [vmem:[%s3430_s7] ss:$0 sm:$0xff] }
  0x15   :  { %v3092_v22 = vld [vmem:[%s3423_s8] sm:$0xff]  }
  0x16   :  { %356 = vmatpush1.bf16.msra.mxu1 %v2660_v9  ;;  %2405 = vmatmul.mubr.msk.bf16.vlgmr.msra.gmra.mrb[4].mxu0 %vm87_vm1, %v71_v13 }
  0x17   :  { %357 = vmatprep.subr.bf16.mxu1 %v2661_v15  ;;  %2409 = vmatpush3.bf16.msra.mxu0 %v2671_v23 }
  0x18   :  { %2410 = vmatprep.mubr.msk.bf16.mxu0 %vm2798_vm0, %v2797_v2  ;;  %2285 = vmatprep.subr.bf16.mxu0 %v2672_v25  ;;  %v3107_v25 = vld [vmem:[%s3424_s9] sm:$0xff]  }
  0x1a   :  { %358 = vmatpush1.bf16.msra.mxu1 %v2663_v17 }
  0x1b   :  { %359 = vmatprep.subr.bf16.mxu1 %v2664_v18 }
  0x1e   :  { %360 = vmatpush1.bf16.msra.mxu1 %v2666_v21  ;;  %2411 = vmatmul.mubr.msk.bf16.vlgmr.msra.gmra.mrb[8].mxu0 %vm87_vm1, %v71_v13 }
  0x1f   :  { %361 = vmatprep.subr.bf16.mxu1 %v347_v24  ;;  %2286 = vmatpush3.bf16.msra.mxu0 %v2673_v29  ;;  %v3098_v24 = vld [vmem:[%s3423_s8 + $0x8] sm:$0xff]   ;;  %v2700_v29 = vld [vmem:[%s3426_s17 + $0x30] sm:$0xff]  }
  0x20   :  { %2287 = vmatprep.subr.bf16.mxu0 %v2674_v30 }
  0x22   :  { %362 = vmatpush1.bf16.msra.mxu1 %v344_v26  ;;  %v3115_v26 = vld [vmem:[%s3424_s9 + $0x8] sm:$0xff]  }
  0x23   :  { %2414 = vmatprep.subr.bf16.mxu1 %v2797_v2  ;;  %2288 = vmatpush3.bf16.msra.mxu0 %v2675_v31  ;;  %v2200_v31 = vld [vmem:[%s3431_s15] ss:$0 sm:$0xff] }
  0x24   :  { %2289 = vmatprep.subr.bf16.mxu0 %v2676_v32 }
  0x25   :  { %2199 = vmatmul.mubr.msk.bf16.vlgmr.msra.gmra.mrb[0].mxu1 %vm336_vm3, %v245_v28  ;;  %v3132_v28 = vld [vmem:[%s3425_s10 + $0x8] sm:$0xff]  }
  0x26   :  { %2430 = vmatprep.mubr.msk.bf16.mxu1 %vm2798_vm0, %v2797_v2  ;;  %2415 = vmatpush3.bf16.msra.mxu1 %v2694_v44 }
  0x27   :  { %2290 = vmatpush3.bf16.msra.mxu0 %v2677_v33  ;;  %2416 = vmatprep.subr.bf16.mxu1 %v2797_v2 }
  0x28   :  { %2291 = vmatprep.subr.bf16.mxu0 %v2678_v34 }
  0x2a   :  { %2417 = vmatpush3.bf16.msra.mxu1 %v2695_v45 }
  0x2b   :  { %2292 = vmatpush3.bf16.msra.mxu0 %v2679_v35  ;;  %2418 = vmatprep.subr.bf16.mxu1 %v2797_v2 }
  0x2c   :  { %2293 = vmatprep.subr.bf16.mxu0 %v2680_v36 }
  0x2e   :  { %2419 = vmatpush3.bf16.msra.mxu1 %v2696_v46 }
  0x2f   :  { %2294 = vmatpush3.bf16.msra.mxu0 %v2681_v37  ;;  %2420 = vmatprep.subr.bf16.mxu1 %v2797_v2 }
  0x30   :  { %2295 = vmatprep.subr.bf16.mxu0 %v2682_v38 }
  0x32   :  { %2421 = vmatpush3.bf16.msra.mxu1 %v2697_v47 }
  0x33   :  { %2296 = vmatpush3.bf16.msra.mxu0 %v2683_v39  ;;  %2422 = vmatprep.subr.bf16.mxu1 %v2797_v2 }
  0x34   :  { %2297 = vmatprep.subr.bf16.mxu0 %v2684_v40 }
  0x36   :  { %2423 = vmatpush3.bf16.msra.mxu1 %v2698_v48 }
  0x37   :  { %2298 = vmatpush3.bf16.msra.mxu0 %v2685_v41  ;;  %2424 = vmatprep.subr.bf16.mxu1 %v2797_v2 }
  0x38   :  { %2299 = vmatprep.subr.bf16.mxu0 %v2686_v42 }
  0x3a   :  { %2425 = vmatpush3.bf16.msra.mxu1 %v2699_v49 }
  0x3b   :  { %2300 = vmatpush3.bf16.msra.mxu0 %v2687_v43  ;;  %2426 = vmatprep.subr.bf16.mxu1 %v2797_v2 }
  0x3c   :  { %2434 = vmatprep.subr.bf16.mxu0 %v2797_v2 }
  0x3e   :  { %2427 = vmatpush3.bf16.msra.mxu1 %v2700_v29 }
  0x3f   :  { %2428 = vmatprep.subr.bf16.mxu1 %v2797_v2 }
  0xe1   :  { %v3061_v51 = vpop.f32.mrb[0].mxu0 }
  0xe2   :  { %v2400_v53 = vpop.f32.mrb[1].mxu0  ;;  %v3159_v38 = vadd.f32 %v3059_v50, %v3061_v51 }
  0xe3   :  { %v128_v54 = vpop.f32.mrb[2].mxu0 }
  0xe4   :  { %v3064_v55 = vadd.f32 %v3059_v50, %v128_v54  ;;  %v2401_v56 = vpop.f32.mrb[3].mxu0 }
  0xe9   :  { %v3071_v59 = vpop.f32.mrb[4].mxu0 }
  0xea   :  { %v2406_v61 = vpop.f32.mrb[5].mxu0  ;;  %v3170_v45 = vadd.f32 %v3069_v58, %v3071_v59 }
  0xeb   :  { %v184_v0 = vpop.f32.mrb[6].mxu0 }
  0xec   :  { %v3077_v3 = vadd.f32 %v3069_v58, %v184_v0  ;;  %v2407_v4 = vpop.f32.mrb[7].mxu0  ;;  %v3176_v58 = vld [vmem:[%s3432_s11] ss:$0 sm:$0xff] }
  0xf1   :  { %v3084_v9 = vpop.f32.mrb[8].mxu0 }
  0xf2   :  { %v2412_v12 = vpop.f32.mrb[9].mxu0  ;;  %v3181_v0 = vadd.f32 %v3082_v8, %v3084_v9 }
  0xf3   :  { %v240_v15 = vpop.f32.mrb[10].mxu0 }
  0xf4   :  { %v3087_v18 = vadd.f32 %v3082_v8, %v240_v15  ;;  %v2413_v19 = vpop.f32.mrb[11].mxu0 }
  0xf8   :  { %v383_v7 = vpop.f32.mrb[0].mxu1 }
  0xf9   :  { %v384_v10 = vadd.f32 %v383_v7, %v264_v5  ;;  %v385_v11 = vpop.f32.mrb[1].mxu1 }
  0xfa   :  { %v386_v13 = vadd.f32 %v385_v11, %v268_v6  ;;  %v387_v14 = vpop.f32.mrb[2].mxu1 }
  0xfb   :  { %v390_v16 = vmax.f32 %v384_v10, 0.0  ;;  %v388_v17 = vpop.f32.mrb[3].mxu1 }
  0xfc   :  { %v391_v20 = vmax.f32 %v386_v13, 0.0 }
  0xfd   :  { %v392_v23 = vpack.c.bf16 %v390_v16, %v390_v16 }
  0xfe   :  { %v393_v21 = vpack.c.bf16 %v391_v20, %v391_v20 }
 0x100   :  { %561 = vmatprep.mubr.bf16.mxu0 %v393_v21 }
 0x101   :  { %562 = vmatmul.mubr.bf16.vlgmr.msra.gmra.mrb[12].mxu0 %v392_v23 }
 0x102   :  { %2435 = vmatpush3.bf16.msra.mxu0 %v3092_v22  ;;  %2438 = vmatprep.mubr.msk.bf16.mxu0 %vm2798_vm0, %v2797_v2 }
 0x103   :  { %2436 = vmatprep.subr.bf16.mxu0 %v2797_v2 }
 0x106   :  { %2437 = vmatpush3.bf16.msra.mxu0 %v3098_v24 }
 0x107   :  { %2442 = vmatprep.subr.bf16.mxu0 %v2797_v2 }
 0x109   :  { %2439 = vmatmul.mubr.bf16.vlgmr.msra.gmra.mrb[16].mxu0 %v2796_v1 }
 0x10a   :  { %2443 = vmatpush3.bf16.msra.mxu0 %v3107_v25  ;;  %2446 = vmatprep.mubr.msk.bf16.mxu0 %vm2798_vm0, %v2797_v2 }
 0x10b   :  { %2444 = vmatprep.subr.bf16.mxu0 %v2797_v2 }
 0x10e   :  { %2445 = vmatpush3.bf16.msra.mxu0 %v3115_v26 }
 0x10f   :  { %2450 = vmatprep.subr.bf16.mxu0 %v2797_v2 }
 0x111   :  { %2447 = vmatmul.mubr.bf16.vlgmr.msra.gmra.mrb[20].mxu0 %v2796_v1 }
 0x112   :  { %2451 = vmatpush3.bf16.msra.mxu0 %v3124_v27  ;;  %2454 = vmatprep.mubr.msk.bf16.mxu0 %vm2798_vm0, %v2797_v2 }
 0x113   :  { %2452 = vmatprep.subr.bf16.mxu0 %v2797_v2 }
 0x116   :  { %2453 = vmatpush3.bf16.msra.mxu0 %v3132_v28 }
 0x117   :  { %2466 = vmatprep.subr.bf16.mxu0 %v2797_v2 }
 0x119   :  { %2455 = vmatmul.mubr.bf16.vlgmr.msra.gmra.mrb[24].mxu0 %v2796_v1  ;;  %v2701_v1 = vld [vmem:[%s3426_s17 + $0x38] sm:$0xff]  }
 0x11a   :  { %2467 = vmatpush3.bf16.msra.mxu0 %v3107_v25  ;;  %2470 = vmatprep.mubr.msk.bf16.mxu0 %vm2798_vm0, %v2797_v2 }
 0x11b   :  { %2468 = vmatprep.subr.bf16.mxu0 %v2797_v2  ;;  %2429 = vmatpush3.bf16.msra.mxu1 %v2701_v1 }
 0x11c   :  { %2458 = vmatprep.subr.bf16.mxu1 %v2797_v2 }
 0x11e   :  { %2469 = vmatpush3.bf16.msra.mxu0 %v3115_v26 }
 0x11f   :  { %2482 = vmatprep.subr.bf16.mxu0 %v2797_v2 }
 0x1d4   :  { %v2301_v30 = vpop.f32.mrb[12].mxu0 }
 0x1d5   :  { %v2302_v32 = vpop.f32.mrb[13].mxu0 }
 0x1d6   :  { %v2303_v33 = vadd.f32 %v2302_v32, %v2301_v30  ;;  %v2304_v34 = vpop.f32.mrb[14].mxu0 }
 0x1d7   :  { %v2305_v35 = vpop.f32.mrb[15].mxu0 }
 0x1d8   :  { %v564_v36 = vadd.f32 %v2303_v33, %v2200_v31 }
 0x1da   :  { %v569_v37 = vpack.c.bf16 %v564_v36, %v564_v36 }
 0x1dc   :  { %2431 = vmatmul.mubr.bf16.vlgmr.msra.gmra.mrb[4].mxu1 %v569_v37  ;;  %v735_v39 = vpop.f32.mrb[16].mxu0 }
 0x1dd   :  { %v860_v40 = vadd.f32 %v735_v39, %v3159_v38  ;;  %v2440_v41 = vpop.f32.mrb[17].mxu0  ;;  %2459 = vmatpush3.bf16.msra.mxu1 %v3092_v22  ;;  %2462 = vmatprep.mubr.msk.bf16.mxu1 %vm2798_vm0, %v2797_v2 }
 0x1de   :  { %v738_v42 = vpop.f32.mrb[18].mxu0  ;;  %2460 = vmatprep.subr.bf16.mxu1 %v2797_v2 }
 0x1df   :  { %v2233_v43 = vmul.f32 -1.442695, %v860_v40  ;;  %v2441_v44 = vpop.f32.mrb[19].mxu0 }
 0x1e1   :  { %2708 = vpow2.f32 %v2233_v43  ;;  %2461 = vmatpush3.bf16.msra.mxu1 %v3098_v24 }
 0x1e2   :  { %2474 = vmatprep.subr.bf16.mxu1 %v2797_v2 }
 0x1e4   :  { %v791_v46 = vpop.f32.mrb[20].mxu0 }
 0x1e5   :  { %v867_v47 = vadd.f32 %v791_v46, %v3170_v45  ;;  %v2448_v48 = vpop.f32.mrb[21].mxu0 }
 0x1e6   :  { %v794_v49 = vpop.f32.mrb[22].mxu0 }
 0x1e7   :  { %v2234_v50 = vmul.f32 -1.442695, %v867_v47  ;;  %v2449_v51 = vpop.f32.mrb[23].mxu0 }
 0x1e9   :  { %2710 = vpow2.f32 %v2234_v50 }
 0x1eb   :  { %v2709_v52 = vpop.eup %2708 }
 0x1ec   :  { %v864_v53 = vadd.f32 1.0, %v2709_v52  ;;  %v854_v54 = vpop.f32.mrb[24].mxu0 }
 0x1ed   :  { %v2456_v56 = vpop.f32.mrb[25].mxu0  ;;  %v855_v62 = vadd.f32 %v3176_v58, %v854_v54 }
 0x1ee   :  { %2712 = vrcp.f32 %v864_v53  ;;  %v857_v57 = vpop.f32.mrb[26].mxu0 }
 0x1ef   :  { %v2457_v60 = vpop.f32.mrb[27].mxu0 }
 0x1f3   :  { %v2711_v59 = vpop.eup %2710 }
 0x1f4   :  { %v871_v61 = vadd.f32 1.0, %v2711_v59 }
 0x1f6   :  { %2714 = vrcp.f32 %v871_v61 }
 0x1f8   :  { %v2713_v63 = vpop.eup %2712 }
 0x1f9   :  { %v874_v4 = vmul.f32 %v2713_v63, %v855_v62 }
 0x1fb   :  { %v875_v5 = vadd.f32 %v874_v4, %v3181_v0 }
 0x1fd   :  { %2716 = vtanh.f32 %v875_v5 }
 0x200   :  { %v2715_v6 = vpop.eup %2714 }
 0x201   :  { %v877_v7 = vsub.f32 1.0, %v2715_v6  ;;  %v879_v11 = vmul.f32 0.0, %v2715_v6 }
 0x207   :  { %v2717_v10 = vpop.eup %2716 }
 0x208   :  { %v878_v12 = vmul.f32 %v2717_v10, %v877_v7 }
 0x20a   :  { %v3184_v13 = vadd.f32 %v879_v11, %v878_v12 }
 0x20c   :  { %v881_v14 = vpack.c.bf16 %v3184_v13, %v3184_v13  ;;  %v1034_v54 = vrot.slane %v3184_v13, 6 }
 0x20e   :  { %2463 = vmatmul.mubr.msk.bf16.vlgmr.msra.gmra.mrb[8].mxu1 %vm697_vm4, %v881_v14  ;;  %2471 = vmatmul.mubr.msk.bf16.vlgmr.msra.gmra.mrb[28].mxu0 %vm697_vm4, %v881_v14 }
 0x20f   :  { %2475 = vmatpush3.bf16.msra.mxu1 %v3124_v27  ;;  %2478 = vmatprep.mubr.msk.bf16.mxu1 %vm2798_vm0, %v2797_v2 }
 0x210   :  { %2476 = vmatprep.subr.bf16.mxu1 %v2797_v2  ;;  %2483 = vmatpush3.bf16.msra.mxu0 %v3092_v22 }
 0x211   :  { %2484 = vmatprep.subr.bf16.mxu0 %v2797_v2  ;;  %2486 = vmatprep.mubr.msk.bf16.mxu0 %vm2798_vm0, %v2797_v2 }
 0x213   :  { %2477 = vmatpush3.bf16.msra.mxu1 %v3132_v28 }
 0x214   :  { %2490 = vmatprep.subr.bf16.mxu1 %v2797_v2  ;;  %2485 = vmatpush3.bf16.msra.mxu0 %v3098_v24 }
 0x215   :  { %2498 = vmatprep.subr.bf16.mxu0 %v2797_v2 }
 0x216   :  { %2479 = vmatmul.mubr.msk.bf16.vlgmr.msra.gmra.mrb[12].mxu1 %vm697_vm4, %v881_v14 }
 0x217   :  { %2491 = vmatpush3.bf16.msra.mxu1 %v3107_v25  ;;  %2494 = vmatprep.mubr.msk.bf16.mxu1 %vm2798_vm0, %v2797_v2 }
 0x218   :  { %2492 = vmatprep.subr.bf16.mxu1 %v2797_v2 }
 0x21b   :  { %2493 = vmatpush3.bf16.msra.mxu1 %v3115_v26 }
 0x21c   :  { %2506 = vmatprep.subr.bf16.mxu1 %v2797_v2 }
 0x2af   :  { %v3209_v8 = vpop.f32.mrb[4].mxu1 }
 0x2b0   :  { %v2432_v9 = vpop.f32.mrb[5].mxu1 }
 0x2b1   :  { %v678_v15 = vpop.f32.mrb[6].mxu1 }
 0x2b2   :  { %v2433_v16 = vpop.f32.mrb[7].mxu1 }
 0x2e1   :  { %v919_v17 = vpop.f32.mrb[8].mxu1  ;;  %v959_v19 = vpop.f32.mrb[28].mxu0 }
 0x2e2   :  { %v1006_v20 = vrot.slane %v919_v17, 6  ;;  %v2464_v21 = vpop.f32.mrb[9].mxu1  ;;  %v2472_v23 = vpop.f32.mrb[29].mxu0  ;;  %v1016_v29 = vrot.slane %v959_v19, 6 }
 0x2e3   :  { %v922_v1 = vpop.f32.mrb[10].mxu1  ;;  %v962_v30 = vpop.f32.mrb[30].mxu0 }
 0x2e4   :  { %v1008_v31 = vadd.f32 %v1006_v20, %v3159_v38  ;;  %v2465_v32 = vpop.f32.mrb[11].mxu1  ;;  %v2473_v33 = vpop.f32.mrb[31].mxu0  ;;  %v1018_v35 = vadd.f32 %v1016_v29, %v3170_v45 }
 0x2e6   :  { %v2238_v34 = vmul.f32 -1.442695, %v1008_v31  ;;  %v2239_v39 = vmul.f32 -1.442695, %v1018_v35 }
 0x2e8   :  { %2718 = vpow2.f32 %v2238_v34 }
 0x2e9   :  { %v999_v36 = vpop.f32.mrb[12].mxu1  ;;  %2720 = vpow2.f32 %v2239_v39 }
 0x2ea   :  { %v2480_v37 = vpop.f32.mrb[13].mxu1  ;;  %v1000_v46 = vadd.f32 %v3176_v58, %v999_v36 }
 0x2eb   :  { %v1002_v40 = vpop.f32.mrb[14].mxu1 }
 0x2ec   :  { %v2481_v41 = vpop.f32.mrb[15].mxu1  ;;  %v1026_v48 = vrot.slane %v1000_v46, 6 }
 0x2f2   :  { %v2719_v42 = vpop.eup %2718 }
 0x2f3   :  { %v1012_v43 = vadd.f32 1.0, %v2719_v42  ;;  %v2721_v44 = vpop.eup %2720 }
 0x2f4   :  { %v1022_v47 = vadd.f32 1.0, %v2721_v44 }
 0x2f5   :  { %2722 = vrcp.f32 %v1012_v43 }
 0x2f6   :  { %2724 = vrcp.f32 %v1022_v47 }
 0x2ff   :  { %v2723_v49 = vpop.eup %2722 }
 0x300   :  { %v1028_v50 = vmul.f32 %v2723_v49, %v1026_v48  ;;  %v2725_v52 = vpop.eup %2724 }
 0x301   :  { %v1031_v53 = vsub.f32 1.0, %v2725_v52  ;;  %v1036_v57 = vmul.f32 %v2725_v52, %v1034_v54 }
 0x302   :  { %v1029_v51 = vadd.f32 %v1028_v50, %v3181_v0 }
 0x304   :  { %2726 = vtanh.f32 %v1029_v51 }
 0x30e   :  { %v2727_v56 = vpop.eup %2726 }
 0x30f   :  { %v1032_v60 = vmul.f32 %v2727_v56, %v1031_v53 }
 0x311   :  { %v1037_v59 = vadd.f32 %v1036_v57, %v1032_v60 }
 0x313   :  { %v1038_v61 = vpack.c.bf16 %v1037_v59, %v1037_v59  ;;  %v1193_v36 = vrot.slane %v1037_v59, 6  ;;  %v1982_v47 = vsel %vm1981_vm5, %v3184_v13, %v1037_v59 }
 0x315   :  { %v1040_v62 = vrot.slane %v1038_v61, 1 }
 0x317   :  { %2487 = vmatmul.mubr.msk.bf16.vlgmr.msra.gmra.mrb[32].mxu0 %vm697_vm4, %v1040_v62  ;;  %2495 = vmatmul.mubr.msk.bf16.vlgmr.msra.gmra.mrb[16].mxu1 %vm697_vm4, %v1040_v62 }
 0x318   :  { %2499 = vmatpush3.bf16.msra.mxu0 %v3124_v27  ;;  %2502 = vmatprep.mubr.msk.bf16.mxu0 %vm2798_vm0, %v2797_v2 }
 0x319   :  { %2500 = vmatprep.subr.bf16.mxu0 %v2797_v2  ;;  %2507 = vmatpush3.bf16.msra.mxu1 %v3092_v22 }
 0x31a   :  { %2508 = vmatprep.subr.bf16.mxu1 %v2797_v2  ;;  %2510 = vmatprep.mubr.msk.bf16.mxu1 %vm2798_vm0, %v2797_v2 }
 0x31c   :  { %2501 = vmatpush3.bf16.msra.mxu0 %v3132_v28 }
 0x31d   :  { %2514 = vmatprep.subr.bf16.mxu0 %v2797_v2  ;;  %2509 = vmatpush3.bf16.msra.mxu1 %v3098_v24 }
 0x31e   :  { %2522 = vmatprep.subr.bf16.mxu1 %v2797_v2 }
 0x31f   :  { %2503 = vmatmul.mubr.msk.bf16.vlgmr.msra.gmra.mrb[36].mxu0 %vm697_vm4, %v1040_v62 }
 0x320   :  { %2515 = vmatpush3.bf16.msra.mxu0 %v3107_v25  ;;  %2518 = vmatprep.mubr.msk.bf16.mxu0 %vm2798_vm0, %v2797_v2 }
 0x321   :  { %2516 = vmatprep.subr.bf16.mxu0 %v2797_v2 }
 0x324   :  { %2517 = vmatpush3.bf16.msra.mxu0 %v3115_v26 }
 0x325   :  { %2530 = vmatprep.subr.bf16.mxu0 %v2797_v2 }
 0x3ea   :  { %v1078_v63 = vpop.f32.mrb[32].mxu0  ;;  %v1118_v4 = vpop.f32.mrb[16].mxu1 }
 0x3eb   :  { %v1165_v5 = vrot.slane %v1078_v63, 4  ;;  %v1175_v6 = vrot.slane %v1118_v4, 4  ;;  %v2488_v7 = vpop.f32.mrb[33].mxu0  ;;  %v2496_v10 = vpop.f32.mrb[17].mxu1 }
 0x3ec   :  { %v1081_v11 = vpop.f32.mrb[34].mxu0  ;;  %v1121_v12 = vpop.f32.mrb[18].mxu1 }
 0x3ed   :  { %v1167_v14 = vadd.f32 %v1165_v5, %v3159_v38  ;;  %v1177_v9 = vadd.f32 %v1175_v6, %v3170_v45  ;;  %v2489_v15 = vpop.f32.mrb[35].mxu0  ;;  %v2497_v16 = vpop.f32.mrb[19].mxu1 }
 0x3ef   :  { %v2243_v17 = vmul.f32 -1.442695, %v1167_v14  ;;  %v2244_v19 = vmul.f32 -1.442695, %v1177_v9 }
 0x3f1   :  { %2728 = vpow2.f32 %v2243_v17 }
 0x3f2   :  { %2730 = vpow2.f32 %v2244_v19  ;;  %v1158_v20 = vpop.f32.mrb[36].mxu0 }
 0x3f3   :  { %v2504_v21 = vpop.f32.mrb[37].mxu0  ;;  %v1159_v33 = vadd.f32 %v3176_v58, %v1158_v20 }
 0x3f4   :  { %v1161_v23 = vpop.f32.mrb[38].mxu0 }
 0x3f5   :  { %v2505_v29 = vpop.f32.mrb[39].mxu0  ;;  %v1185_v34 = vrot.slane %v1159_v33, 4 }
 0x3fb   :  { %v2729_v1 = vpop.eup %2728 }
 0x3fc   :  { %v2731_v30 = vpop.eup %2730  ;;  %v1171_v31 = vadd.f32 1.0, %v2729_v1 }
 0x3fd   :  { %v1181_v32 = vadd.f32 1.0, %v2731_v30 }
 0x3fe   :  { %2732 = vrcp.f32 %v1171_v31 }
 0x3ff   :  { %2734 = vrcp.f32 %v1181_v32 }
 0x408   :  { %v2733_v35 = vpop.eup %2732 }
 0x409   :  { %v2735_v37 = vpop.eup %2734  ;;  %v1187_v39 = vmul.f32 %v2733_v35, %v1185_v34 }
 0x40a   :  { %v1195_v40 = vmul.f32 %v2735_v37, %v1193_v36  ;;  %v1190_v42 = vsub.f32 1.0, %v2735_v37 }
 0x40b   :  { %v1188_v41 = vadd.f32 %v1187_v39, %v3181_v0 }
 0x40d   :  { %2736 = vtanh.f32 %v1188_v41 }
 0x417   :  { %v2737_v43 = vpop.eup %2736 }
 0x418   :  { %v1191_v44 = vmul.f32 %v2737_v43, %v1190_v42 }
 0x41a   :  { %v1196_v46 = vadd.f32 %v1195_v40, %v1191_v44 }
 0x41c   :  { %v1197_v48 = vpack.c.bf16 %v1196_v46, %v1196_v46  ;;  %v1984_v49 = vsel %vm1983_vm6, %v1982_v47, %v1196_v46  ;;  %v1352_v17 = vrot.slane %v1196_v46, 6 }
 0x41e   :  { %v1199_v50 = vrot.slane %v1197_v48, 2 }
 0x420   :  { %2511 = vmatmul.mubr.msk.bf16.vlgmr.msra.gmra.mrb[20].mxu1 %vm697_vm4, %v1199_v50  ;;  %2519 = vmatmul.mubr.msk.bf16.vlgmr.msra.gmra.mrb[40].mxu0 %vm697_vm4, %v1199_v50 }
 0x421   :  { %2523 = vmatpush3.bf16.msra.mxu1 %v3124_v27  ;;  %2526 = vmatprep.mubr.msk.bf16.mxu1 %vm2798_vm0, %v2797_v2 }
 0x422   :  { %2524 = vmatprep.subr.bf16.mxu1 %v2797_v2  ;;  %2531 = vmatpush3.bf16.msra.mxu0 %v3092_v22 }
 0x423   :  { %2532 = vmatprep.subr.bf16.mxu0 %v2797_v2  ;;  %2534 = vmatprep.mubr.msk.bf16.mxu0 %vm2798_vm0, %v2797_v2 }
 0x425   :  { %2525 = vmatpush3.bf16.msra.mxu1 %v3132_v28 }
 0x426   :  { %2538 = vmatprep.subr.bf16.mxu1 %v2797_v2  ;;  %2533 = vmatpush3.bf16.msra.mxu0 %v3098_v24 }
 0x427   :  { %2546 = vmatprep.subr.bf16.mxu0 %v2797_v2 }
 0x428   :  { %2527 = vmatmul.mubr.msk.bf16.vlgmr.msra.gmra.mrb[24].mxu1 %vm697_vm4, %v1199_v50 }
 0x429   :  { %2539 = vmatpush3.bf16.msra.mxu1 %v3107_v25  ;;  %2542 = vmatprep.mubr.msk.bf16.mxu1 %vm2798_vm0, %v2797_v2 }
 0x42a   :  { %2540 = vmatprep.subr.bf16.mxu1 %v2797_v2 }
 0x42d   :  { %2541 = vmatpush3.bf16.msra.mxu1 %v3115_v26 }
 0x42e   :  { %2554 = vmatprep.subr.bf16.mxu1 %v2797_v2 }
 0x4f3   :  { %v1237_v13 = vpop.f32.mrb[20].mxu1  ;;  %v1277_v51 = vpop.f32.mrb[40].mxu0 }
 0x4f4   :  { %v1324_v52 = vrot.slane %v1237_v13, 2  ;;  %v1334_v53 = vrot.slane %v1277_v51, 2  ;;  %v2512_v54 = vpop.f32.mrb[21].mxu1  ;;  %v2520_v56 = vpop.f32.mrb[41].mxu0 }
 0x4f5   :  { %v1240_v57 = vpop.f32.mrb[22].mxu1  ;;  %v1280_v60 = vpop.f32.mrb[42].mxu0 }
 0x4f6   :  { %v1326_v59 = vadd.f32 %v1324_v52, %v3159_v38  ;;  %v1336_v61 = vadd.f32 %v1334_v53, %v3170_v45  ;;  %v2513_v62 = vpop.f32.mrb[23].mxu1  ;;  %v2521_v63 = vpop.f32.mrb[43].mxu0 }
 0x4f8   :  { %v2248_v4 = vmul.f32 -1.442695, %v1326_v59  ;;  %v2249_v5 = vmul.f32 -1.442695, %v1336_v61 }
 0x4fa   :  { %2738 = vpow2.f32 %v2248_v4 }
 0x4fb   :  { %2740 = vpow2.f32 %v2249_v5  ;;  %v1317_v6 = vpop.f32.mrb[24].mxu1 }
 0x4fc   :  { %v2528_v7 = vpop.f32.mrb[25].mxu1  ;;  %v1318_v38 = vadd.f32 %v3176_v58, %v1317_v6 }
 0x4fd   :  { %v1320_v10 = vpop.f32.mrb[26].mxu1 }
 0x4fe   :  { %v2529_v11 = vpop.f32.mrb[27].mxu1  ;;  %v1344_v16 = vrot.slane %v1318_v38, 2 }
 0x504   :  { %v2739_v12 = vpop.eup %2738 }
 0x505   :  { %v2741_v14 = vpop.eup %2740  ;;  %v1330_v9 = vadd.f32 1.0, %v2739_v12 }
 0x506   :  { %v1340_v15 = vadd.f32 1.0, %v2741_v14 }
 0x507   :  { %2742 = vrcp.f32 %v1330_v9 }
 0x508   :  { %2744 = vrcp.f32 %v1340_v15 }
 0x511   :  { %v2743_v45 = vpop.eup %2742 }
 0x512   :  { %v2745_v19 = vpop.eup %2744  ;;  %v1346_v20 = vmul.f32 %v2743_v45, %v1344_v16 }
 0x513   :  { %v1354_v21 = vmul.f32 %v2745_v19, %v1352_v17  ;;  %v1349_v29 = vsub.f32 1.0, %v2745_v19 }
 0x514   :  { %v1347_v23 = vadd.f32 %v1346_v20, %v3181_v0 }
 0x516   :  { %2746 = vtanh.f32 %v1347_v23 }
 0x520   :  { %v2747_v1 = vpop.eup %2746 }
 0x521   :  { %v1350_v30 = vmul.f32 %v2747_v1, %v1349_v29 }
 0x523   :  { %v1355_v31 = vadd.f32 %v1354_v21, %v1350_v30 }
 0x525   :  { %v1356_v32 = vpack.c.bf16 %v1355_v31, %v1355_v31  ;;  %v3270_v33 = vsel %vm1985_vm7, %v1984_v49, %v1355_v31  ;;  %v1502_v60 = vrot.slane %v1355_v31, 6 }
 0x527   :  { %v1358_v34 = vrot.slane %v1356_v32, 3 }
 0x529   :  { %2535 = vmatmul.mubr.msk.bf16.vlgmr.msra.gmra.mrb[44].mxu0 %vm697_vm4, %v1358_v34  ;;  %2543 = vmatmul.mubr.msk.bf16.vlgmr.msra.gmra.mrb[28].mxu1 %vm697_vm4, %v1358_v34 }
 0x52a   :  { %2547 = vmatpush3.bf16.msra.mxu0 %v3124_v27  ;;  %2550 = vmatprep.mubr.msk.bf16.mxu0 %vm2798_vm0, %v2797_v2 }
 0x52b   :  { %2548 = vmatprep.subr.bf16.mxu0 %v2797_v2  ;;  %2555 = vmatpush3.bf16.msra.mxu1 %v3092_v22 }
 0x52c   :  { %2556 = vmatprep.subr.bf16.mxu1 %v2797_v2  ;;  %2558 = vmatprep.mubr.msk.bf16.mxu1 %vm2798_vm0, %v2797_v2 }
 0x52e   :  { %2549 = vmatpush3.bf16.msra.mxu0 %v3132_v28 }
 0x52f   :  { %2562 = vmatprep.subr.bf16.mxu0 %v2797_v2  ;;  %2557 = vmatpush3.bf16.msra.mxu1 %v3098_v24 }
 0x530   :  { %2570 = vmatprep.subr.bf16.mxu1 %v2797_v2 }
 0x531   :  { %2551 = vmatmul.mubr.msk.bf16.vlgmr.msra.gmra.mrb[48].mxu0 %vm697_vm4, %v1358_v34 }
 0x532   :  { %2563 = vmatpush3.bf16.msra.mxu0 %v3107_v25  ;;  %2566 = vmatprep.mubr.msk.bf16.mxu0 %vm2798_vm0, %v2797_v2 }
 0x533   :  { %2564 = vmatprep.subr.bf16.mxu0 %v2797_v2 }
 0x536   :  { %2565 = vmatpush3.bf16.msra.mxu0 %v3115_v26 }
 0x537   :  { %2578 = vmatprep.subr.bf16.mxu0 %v2797_v2 }
 0x5fc   :  { %v1396_v0 = vpop.f32.mrb[44].mxu0  ;;  %v1436_v35 = vpop.f32.mrb[28].mxu1 }
 0x5fd   :  { %v1482_v36 = vadd.f32 %v1396_v0, %v3064_v55  ;;  %v1489_v37 = vadd.f32 %v1436_v35, %v3077_v3  ;;  %v2536_v39 = vpop.f32.mrb[45].mxu0  ;;  %v2544_v40 = vpop.f32.mrb[29].mxu1 }
 0x5fe   :  { %v1399_v41 = vpop.f32.mrb[46].mxu0  ;;  %v1439_v42 = vpop.f32.mrb[30].mxu1 }
 0x5ff   :  { %v2253_v43 = vmul.f32 -1.442695, %v1482_v36  ;;  %v2254_v44 = vmul.f32 -1.442695, %v1489_v37  ;;  %v2537_v46 = vpop.f32.mrb[47].mxu0  ;;  %v2545_v47 = vpop.f32.mrb[31].mxu1 }
 0x601   :  { %2748 = vpow2.f32 %v2253_v43 }
 0x602   :  { %2750 = vpow2.f32 %v2254_v44 }
 0x604   :  { %v1476_v48 = vpop.f32.mrb[48].mxu0 }
 0x605   :  { %v2552_v49 = vpop.f32.mrb[49].mxu0  ;;  %v1477_v56 = vadd.f32 %v3176_v58, %v1476_v48 }
 0x606   :  { %v1479_v50 = vpop.f32.mrb[50].mxu0 }
 0x607   :  { %v2553_v13 = vpop.f32.mrb[51].mxu0 }
 0x60b   :  { %v2749_v51 = vpop.eup %2748 }
 0x60c   :  { %v2751_v52 = vpop.eup %2750  ;;  %v1486_v53 = vadd.f32 1.0, %v2749_v51 }
 0x60d   :  { %v1493_v54 = vadd.f32 1.0, %v2751_v52 }
 0x60e   :  { %2752 = vrcp.f32 %v1486_v53 }
 0x60f   :  { %2754 = vrcp.f32 %v1493_v54 }
 0x618   :  { %v2753_v57 = vpop.eup %2752 }
 0x619   :  { %v2755_v59 = vpop.eup %2754  ;;  %v1496_v61 = vmul.f32 %v2753_v57, %v1477_v56 }
 0x61a   :  { %v1504_v62 = vmul.f32 %v2755_v59, %v1502_v60  ;;  %v1499_v4 = vsub.f32 1.0, %v2755_v59 }
 0x61b   :  { %v1497_v63 = vadd.f32 %v1496_v61, %v3087_v18 }
 0x61d   :  { %2756 = vtanh.f32 %v1497_v63 }
 0x627   :  { %v2757_v5 = vpop.eup %2756 }
 0x628   :  { %v1500_v6 = vmul.f32 %v2757_v5, %v1499_v4 }
 0x62a   :  { %v3297_v7 = vadd.f32 %v1504_v62, %v1500_v6 }
 0x62c   :  { %v1506_v10 = vpack.c.bf16 %v3297_v7, %v3297_v7  ;;  %v1659_v46 = vrot.slane %v3297_v7, 6 }
 0x62e   :  { %2559 = vmatmul.mubr.msk.bf16.vlgmr.msra.gmra.mrb[32].mxu1 %vm697_vm4, %v1506_v10  ;;  %2567 = vmatmul.mubr.msk.bf16.vlgmr.msra.gmra.mrb[52].mxu0 %vm697_vm4, %v1506_v10 }
 0x62f   :  { %2571 = vmatpush3.bf16.msra.mxu1 %v3124_v27  ;;  %2574 = vmatprep.mubr.msk.bf16.mxu1 %vm2798_vm0, %v2797_v2 }
 0x630   :  { %2572 = vmatprep.subr.bf16.mxu1 %v2797_v2  ;;  %2579 = vmatpush3.bf16.msra.mxu0 %v3092_v22 }
 0x631   :  { %2580 = vmatprep.subr.bf16.mxu0 %v2797_v2  ;;  %2582 = vmatprep.mubr.msk.bf16.mxu0 %vm2798_vm0, %v2797_v2 }
 0x633   :  { %2573 = vmatpush3.bf16.msra.mxu1 %v3132_v28 }
 0x634   :  { %2586 = vmatprep.subr.bf16.mxu1 %v2797_v2  ;;  %2581 = vmatpush3.bf16.msra.mxu0 %v3098_v24 }
 0x635   :  { %2594 = vmatprep.subr.bf16.mxu0 %v2797_v2 }
 0x636   :  { %2575 = vmatmul.mubr.msk.bf16.vlgmr.msra.gmra.mrb[36].mxu1 %vm697_vm4, %v1506_v10 }
 0x637   :  { %2587 = vmatpush3.bf16.msra.mxu1 %v3107_v25  ;;  %2590 = vmatprep.mubr.msk.bf16.mxu1 %vm2798_vm0, %v2797_v2 }
 0x638   :  { %2588 = vmatprep.subr.bf16.mxu1 %v2797_v2 }
 0x63b   :  { %2589 = vmatpush3.bf16.msra.mxu1 %v3115_v26 }
 0x63c   :  { %2602 = vmatprep.subr.bf16.mxu1 %v2797_v2 }
 0x701   :  { %v1544_v11 = vpop.f32.mrb[32].mxu1  ;;  %v1584_v12 = vpop.f32.mrb[52].mxu0 }
 0x702   :  { %v1631_v14 = vrot.slane %v1544_v11, 6  ;;  %v2560_v9 = vpop.f32.mrb[33].mxu1  ;;  %v2568_v15 = vpop.f32.mrb[53].mxu0  ;;  %v1641_v38 = vrot.slane %v1584_v12, 6 }
 0x703   :  { %v1547_v16 = vpop.f32.mrb[34].mxu1  ;;  %v1587_v45 = vpop.f32.mrb[54].mxu0 }
 0x704   :  { %v1633_v17 = vadd.f32 %v1631_v14, %v3064_v55  ;;  %v2561_v19 = vpop.f32.mrb[35].mxu1  ;;  %v2569_v20 = vpop.f32.mrb[55].mxu0  ;;  %v1643_v23 = vadd.f32 %v1641_v38, %v3077_v3 }
 0x706   :  { %v2258_v21 = vmul.f32 -1.442695, %v1633_v17  ;;  %v2259_v30 = vmul.f32 -1.442695, %v1643_v23 }
 0x708   :  { %2758 = vpow2.f32 %v2258_v21 }
 0x709   :  { %v1624_v29 = vpop.f32.mrb[36].mxu1  ;;  %2760 = vpow2.f32 %v2259_v30 }
 0x70a   :  { %v2576_v1 = vpop.f32.mrb[37].mxu1  ;;  %v1625_v36 = vadd.f32 %v3176_v58, %v1624_v29 }
 0x70b   :  { %v1627_v31 = vpop.f32.mrb[38].mxu1 }
 0x70c   :  { %v2577_v32 = vpop.f32.mrb[39].mxu1  ;;  %v1651_v39 = vrot.slane %v1625_v36, 6 }
 0x712   :  { %v2759_v34 = vpop.eup %2758 }
 0x713   :  { %v1637_v0 = vadd.f32 1.0, %v2759_v34  ;;  %v2761_v35 = vpop.eup %2760 }
 0x714   :  { %v1647_v37 = vadd.f32 1.0, %v2761_v35  ;;  %v2705_v35 = vld [vmem:[%s3434_s19 + $0x8] sm:$0xff]  }
 0x715   :  { %2762 = vrcp.f32 %v1637_v0 }
 0x716   :  { %2764 = vrcp.f32 %v1647_v37 }
 0x71f   :  { %v2763_v40 = vpop.eup %2762 }
 0x720   :  { %v1653_v41 = vmul.f32 %v2763_v40, %v1651_v39  ;;  %v2765_v43 = vpop.eup %2764 }
 0x721   :  { %v1656_v44 = vsub.f32 1.0, %v2765_v43  ;;  %v1661_v48 = vmul.f32 %v2765_v43, %v1659_v46 }
 0x722   :  { %v1654_v42 = vadd.f32 %v1653_v41, %v3087_v18 }
 0x724   :  { %2766 = vtanh.f32 %v1654_v42 }
 0x72e   :  { %v2767_v47 = vpop.eup %2766 }
 0x72f   :  { %v1657_v49 = vmul.f32 %v2767_v47, %v1656_v44 }
 0x731   :  { %v1662_v50 = vadd.f32 %v1661_v48, %v1657_v49 }
 0x733   :  { %v1663_v13 = vpack.c.bf16 %v1662_v50, %v1662_v50  ;;  %v1818_v45 = vrot.slane %v1662_v50, 6  ;;  %v1987_v31 = vsel %vm1981_vm5, %v3297_v7, %v1662_v50  ;;  %v2703_v7 = vld [vmem:[%s3433_s16 + $0x8] sm:$0xff]  }
 0x735   :  { %v1665_v51 = vrot.slane %v1663_v13, 1 }
 0x737   :  { %2583 = vmatmul.mubr.msk.bf16.vlgmr.msra.gmra.mrb[56].mxu0 %vm697_vm4, %v1665_v51  ;;  %2591 = vmatmul.mubr.msk.bf16.vlgmr.msra.gmra.mrb[40].mxu1 %vm697_vm4, %v1665_v51 }
 0x738   :  { %2595 = vmatpush3.bf16.msra.mxu0 %v3124_v27  ;;  %2598 = vmatprep.mubr.msk.bf16.mxu0 %vm2798_vm0, %v2797_v2 }
 0x739   :  { %2596 = vmatprep.subr.bf16.mxu0 %v2797_v2  ;;  %2603 = vmatpush3.bf16.msra.mxu1 %v3092_v22 }
 0x73a   :  { %2604 = vmatprep.subr.bf16.mxu1 %v2797_v2  ;;  %2606 = vmatprep.mubr.msk.bf16.mxu1 %vm2798_vm0, %v2797_v2 }
 0x73c   :  { %2597 = vmatpush3.bf16.msra.mxu0 %v3132_v28 }
 0x73d   :  { %2610 = vmatprep.subr.bf16.mxu0 %v2797_v2  ;;  %2605 = vmatpush3.bf16.msra.mxu1 %v3098_v24 }
 0x73e   :  { %2618 = vmatprep.subr.bf16.mxu1 %v2797_v2 }
 0x73f   :  { %2599 = vmatmul.mubr.msk.bf16.vlgmr.msra.gmra.mrb[60].mxu0 %vm697_vm4, %v1665_v51 }
 0x740   :  { %2611 = vmatpush3.bf16.msra.mxu0 %v3107_v25  ;;  %2614 = vmatprep.mubr.msk.bf16.mxu0 %vm2798_vm0, %v2797_v2 }
 0x741   :  { %2612 = vmatprep.subr.bf16.mxu0 %v2797_v2 }
 0x744   :  { %2613 = vmatpush3.bf16.msra.mxu0 %v3115_v26 }
 0x745   :  { %2626 = vmatprep.subr.bf16.mxu0 %v2797_v2 }
 0x80a   :  { %v1703_v22 = vpop.f32.mrb[56].mxu0  ;;  %v1743_v52 = vpop.f32.mrb[40].mxu1 }
 0x80b   :  { %v1790_v53 = vrot.slane %v1703_v22, 4  ;;  %v1800_v54 = vrot.slane %v1743_v52, 4  ;;  %v2584_v24 = vpop.f32.mrb[57].mxu0  ;;  %v2592_v56 = vpop.f32.mrb[41].mxu1 }
 0x80c   :  { %v1706_v57 = vpop.f32.mrb[58].mxu0  ;;  %v1746_v60 = vpop.f32.mrb[42].mxu1 }
 0x80d   :  { %v1792_v59 = vadd.f32 %v1790_v53, %v3064_v55  ;;  %v1802_v25 = vadd.f32 %v1800_v54, %v3077_v3  ;;  %v2585_v61 = vpop.f32.mrb[59].mxu0  ;;  %v2593_v62 = vpop.f32.mrb[43].mxu1 }
 0x80f   :  { %v2263_v63 = vmul.f32 -1.442695, %v1792_v59  ;;  %v2264_v4 = vmul.f32 -1.442695, %v1802_v25 }
 0x811   :  { %2768 = vpow2.f32 %v2263_v63 }
 0x812   :  { %2770 = vpow2.f32 %v2264_v4  ;;  %v1783_v26 = vpop.f32.mrb[60].mxu0 }
 0x813   :  { %v2600_v5 = vpop.f32.mrb[61].mxu0  ;;  %v1784_v15 = vadd.f32 %v3176_v58, %v1783_v26 }
 0x814   :  { %v1786_v6 = vpop.f32.mrb[62].mxu0 }
 0x815   :  { %v2601_v10 = vpop.f32.mrb[63].mxu0  ;;  %v1810_v38 = vrot.slane %v1784_v15, 4 }
 0x81b   :  { %v2769_v11 = vpop.eup %2768 }
 0x81c   :  { %v2771_v12 = vpop.eup %2770  ;;  %v1796_v14 = vadd.f32 1.0, %v2769_v11 }
 0x81d   :  { %v1806_v9 = vadd.f32 1.0, %v2771_v12  ;;  %v2217_v12 = vld [vmem:[%s3435_s18] ss:$0 sm:$0xff] }
 0x81e   :  { %2772 = vrcp.f32 %v1796_v14 }
 0x81f   :  { %2774 = vrcp.f32 %v1806_v9 }
 0x828   :  { %v2773_v16 = vpop.eup %2772 }
 0x829   :  { %v2775_v17 = vpop.eup %2774  ;;  %v1812_v19 = vmul.f32 %v2773_v16, %v1810_v38 }
 0x82a   :  { %v1820_v20 = vmul.f32 %v2775_v17, %v1818_v45  ;;  %v1815_v23 = vsub.f32 1.0, %v2775_v17 }
 0x82b   :  { %v1813_v21 = vadd.f32 %v1812_v19, %v3087_v18 }
 0x82d   :  { %2776 = vtanh.f32 %v1813_v21 }
 0x837   :  { %v2777_v29 = vpop.eup %2776 }
 0x838   :  { %v1816_v1 = vmul.f32 %v2777_v29, %v1815_v23 }
 0x83a   :  { %v1821_v30 = vadd.f32 %v1820_v20, %v1816_v1 }
 0x83c   :  { %v1822_v32 = vpack.c.bf16 %v1821_v30, %v1821_v30  ;;  %v3355_v34 = vsel %vm1983_vm6, %v1987_v31, %v1821_v30  ;;  %v1977_v59 = vrot.slane %v1821_v30, 6 }
 0x83e   :  { %v1824_v0 = vrot.slane %v1822_v32, 2 }
 0x840   :  { %2607 = vmatmul.mubr.msk.bf16.vlgmr.msra.gmra.mrb[44].mxu1 %vm697_vm4, %v1824_v0  ;;  %2615 = vmatmul.mubr.msk.bf16.vlgmr.msra.gmra.mrb[64].mxu0 %vm697_vm4, %v1824_v0 }
 0x841   :  { %2619 = vmatpush3.bf16.msra.mxu1 %v3124_v27  ;;  %2622 = vmatprep.mubr.msk.bf16.mxu1 %vm2798_vm0, %v2797_v2  ;;  %v2702_v27 = vld [vmem:[%s3433_s16] sm:$0xff]  }
 0x842   :  { %2620 = vmatprep.subr.bf16.mxu1 %v2797_v2  ;;  %2630 = vmatprep.mubr.msk.bf16.mxu0 %vm2798_vm0, %v2797_v2 }
 0x843   :  { %2627 = vmatpush3.bf16.msra.mxu0 %v2702_v27 }
 0x844   :  { %2628 = vmatprep.subr.bf16.mxu0 %v2797_v2 }
 0x845   :  { %2621 = vmatpush3.bf16.msra.mxu1 %v3132_v28  ;;  %v2704_v28 = vld [vmem:[%s3434_s19] sm:$0xff]  }
 0x846   :  { %2634 = vmatprep.subr.bf16.mxu1 %v2797_v2 }
 0x847   :  { %2629 = vmatpush3.bf16.msra.mxu0 %v2703_v7 }
 0x848   :  { %2623 = vmatmul.mubr.msk.bf16.vlgmr.msra.gmra.mrb[48].mxu1 %vm697_vm4, %v1824_v0 }
 0x849   :  { %2642 = vmatprep.mubr.msk.bf16.mxu1 %vm2798_vm0, %v2797_v2  ;;  %2635 = vmatpush3.bf16.msra.mxu1 %v2704_v28 }
 0x84a   :  { %2636 = vmatprep.subr.bf16.mxu1 %v2797_v2 }
 0x84d   :  { %2637 = vmatpush3.bf16.msra.mxu1 %v2705_v35 }
 0x84e   :  { %2638 = vmatprep.subr.bf16.mxu1 %v2797_v2 }
 0x913   :  { %v1862_v36 = vpop.f32.mrb[44].mxu1  ;;  %v1902_v37 = vpop.f32.mrb[64].mxu0 }
 0x914   :  { %v1949_v39 = vrot.slane %v1862_v36, 2  ;;  %v1959_v40 = vrot.slane %v1902_v37, 2  ;;  %v2608_v41 = vpop.f32.mrb[45].mxu1  ;;  %v2616_v42 = vpop.f32.mrb[65].mxu0 }
 0x915   :  { %v1865_v43 = vpop.f32.mrb[46].mxu1  ;;  %v1905_v44 = vpop.f32.mrb[66].mxu0 }
 0x916   :  { %v1951_v46 = vadd.f32 %v1949_v39, %v3064_v55  ;;  %v1961_v47 = vadd.f32 %v1959_v40, %v3077_v3  ;;  %v2609_v48 = vpop.f32.mrb[47].mxu1  ;;  %v2617_v49 = vpop.f32.mrb[67].mxu0 }
 0x918   :  { %v2268_v50 = vmul.f32 -1.442695, %v1951_v46  ;;  %v2269_v13 = vmul.f32 -1.442695, %v1961_v47 }
 0x91a   :  { %2778 = vpow2.f32 %v2268_v50 }
 0x91b   :  { %2780 = vpow2.f32 %v2269_v13  ;;  %v1942_v51 = vpop.f32.mrb[48].mxu1 }
 0x91c   :  { %v2624_v22 = vpop.f32.mrb[49].mxu1  ;;  %v1943_v55 = vadd.f32 %v3176_v58, %v1942_v51  ;;  %v2706_v58 = vld [vmem:[%s3434_s19 + $0x10] sm:$0xff]  }
 0x91d   :  { %v1945_v52 = vpop.f32.mrb[50].mxu1  ;;  %2639 = vmatpush3.bf16.msra.mxu1 %v2706_v58 }
 0x91e   :  { %v2625_v53 = vpop.f32.mrb[51].mxu1  ;;  %v1969_v60 = vrot.slane %v1943_v55, 2  ;;  %2640 = vmatprep.subr.bf16.mxu1 %v2797_v2 }
 0x924   :  { %v2779_v54 = vpop.eup %2778 }
 0x925   :  { %v2781_v24 = vpop.eup %2780  ;;  %v1955_v56 = vadd.f32 1.0, %v2779_v54 }
 0x926   :  { %v1965_v57 = vadd.f32 1.0, %v2781_v24 }
 0x927   :  { %2782 = vrcp.f32 %v1955_v56 }
 0x928   :  { %2784 = vrcp.f32 %v1965_v57 }
 0x931   :  { %v2783_v3 = vpop.eup %2782 }
 0x932   :  { %v2785_v25 = vpop.eup %2784  ;;  %v1971_v61 = vmul.f32 %v2783_v3, %v1969_v60 }
 0x933   :  { %v1979_v62 = vmul.f32 %v2785_v25, %v1977_v59  ;;  %v1974_v4 = vsub.f32 1.0, %v2785_v25 }
 0x934   :  { %v1972_v63 = vadd.f32 %v1971_v61, %v3087_v18  ;;  %v2707_v18 = vld [vmem:[%s3434_s19 + $0x18] sm:$0xff]  }
 0x935   :  { %2641 = vmatpush3.bf16.msra.mxu1 %v2707_v18 }
 0x936   :  { %2786 = vtanh.f32 %v1972_v63 }
 0x940   :  { %v2787_v26 = vpop.eup %2786 }
 0x941   :  { %v1975_v5 = vmul.f32 %v2787_v26, %v1974_v4 }
 0x943   :  { %v1980_v6 = vadd.f32 %v1979_v62, %v1975_v5 }
 0x945   :  { %v1989_v10 = vsel %vm1985_vm7, %v3355_v34, %v1980_v6 }
 0x946   :  { %v2000_v11 = vpack.c.bf16 %v1989_v10, %v3270_v33  ;;  %v676_v33 = vadd.f32 %v2217_v12, %v3209_v8  ;;  %v2273_v8 = vld [vmem:[%s3436_s20] ss:$0 sm:$0xff] }
 0x948   :  { %2631 = vmatmul.mubr.msk.bf16.vlgmr.msra.gmra.mrb[68].mxu0 %vm697_vm4, %v2000_v11  ;;  %v1991_v14 = vrot.slane %v676_v33, 6  ;;  %v1993_v9 = vrot.slane %v676_v33, 4  ;;  %v1995_v16 = vrot.slane %v676_v33, 2 }
 0x94a   :  { %v1997_v15 = vsel %vm1981_vm5, %v676_v33, %v1991_v14 }
 0x94b   :  { %v1998_v38 = vsel %vm1983_vm6, %v1997_v15, %v1993_v9 }
 0x94c   :  { %v1999_v2 = vsel %vm1985_vm7, %v1998_v38, %v1995_v16 }
 0xa1b   :  { %v2054_v45 = vpop.f32.mrb[68].mxu0 }
 0xa1c   :  { %v2055_v17 = vadd.f32 %v2054_v45, %v1999_v2  ;;  %v2632_v19 = vpop.f32.mrb[69].mxu0 }
 0xa1d   :  { %v2057_v20 = vpop.f32.mrb[70].mxu0 }
 0xa1e   :  { %v2058_v21 = vadd.f32 %v2057_v20, %v1999_v2  ;;  %v2633_v23 = vpop.f32.mrb[71].mxu0  ;;  %v2061_v29 = vmax.f32 %v2055_v17, 0.0 }
 0xa20   :  { %v2062_v1 = vmax.f32 %v2058_v21, 0.0 }
 0xa22   :  { %v2063_v30 = vpack.c.bf16 %v2062_v1, %v2061_v29 }
 0xa24   :  { %2643 = vmatmul.mubr.msk.bf16.vlgmr.msra.gmra.mrb[52].mxu1 %vm2103_vm8, %v2063_v30 }
 0xaf7   :  { %v2141_v31 = vpop.f32.mrb[52].mxu1 }
 0xaf8   :  { %v2142_v32 = vadd.f32 %v2273_v8, %v2141_v31  ;;  %v2644_v34 = vpop.f32.mrb[53].mxu1 }
 0xaf9   :  { %v2144_v0 = vpop.f32.mrb[54].mxu1 }
 0xafa   :  { %2148 = vmax.xlane.f32.xlu0 %v2142_v32  ;;  %v2645_v27 = vpop.f32.mrb[55].mxu1  ;;  %v2145_v7 = vadd.f32 %v2273_v8, %v2144_v0 }
 0xafe   :  { %2150 = vmax.xlane.f32.xlu0 %v2145_v7 }
 0xb87   :  { %v2149_v28 = vpop.xlane.xlu0 %2148 }
 0xb88   :  { %v2152_v35 = vsub.f32 %v2142_v32, %v2149_v28 }
 0xb8a   :  { %v2154_v36 = vmul.f32 1.442695, %v2152_v35 }
 0xb8b   :  { %v2151_v37 = vpop.xlane.xlu0 %2150 }
 0xb8c   :  { %v2153_v39 = vsub.f32 %v2145_v7, %v2151_v37  ;;  %2788 = vpow2.f32 %v2154_v36 }
 0xb8e   :  { %v2156_v40 = vmul.f32 1.442695, %v2153_v39 }
 0xb90   :  { %2790 = vpow2.f32 %v2156_v40 }
 0xb96   :  { %v2789_v41 = vpop.eup %2788 }
 0xb97   :  { %2158 = vadd.xlane.f32.xlu1 %v2789_v41 }
 0xb9a   :  { %v2791_v42 = vpop.eup %2790 }
 0xb9b   :  { %2160 = vadd.xlane.f32.xlu1 %v2791_v42 }
 0xc24   :  { %v2159_v43 = vpop.xlane.xlu1 %2158 }
 0xc25   :  { %2792 = vlog2.f32 %v2159_v43 }
 0xc28   :  { %v2161_v44 = vpop.xlane.xlu1 %2160 }
 0xc29   :  { %2794 = vlog2.f32 %v2161_v44 }
 0xc2f   :  { %v2793_v46 = vpop.eup %2792 }
 0xc30   :  { %v2163_v47 = vmul.f32 0.6931472, %v2793_v46 }
 0xc32   :  { %v2166_v48 = vadd.f32 %v2163_v47, %v2149_v28 }
 0xc33   :  { %v2795_v49 = vpop.eup %2794 }
 0xc34   :  { %v2168_v50 = vsub.f32 %v2142_v32, %v2166_v48  ;;  %v2165_v13 = vmul.f32 0.6931472, %v2795_v49 }
 0xc36   :  { %2170 = vst [vmem:[%s3437_s21] sm:$0xff] %v2168_v50  ;;  %v2167_v51 = vadd.f32 %v2165_v13, %v2151_v37 }
 0xc38   :  { %v2169_v22 = vsub.f32 %v2145_v7, %v2167_v51 }
 0xc3a   :  { %2171 = vst [vmem:[%s3437_s21 + $0x8] sm:$0xff] %v2169_v22 }

</bundles_post_ra>
